<compile_context>
chip_gen: v6e
topology: v6e:2x2x1
jax: 0.10.0
libtpu: 0.0.40
codegen_flags: <defaults>
</compile_context>

<pallas_src>
import functools

import jax
import jax.numpy as jnp
from jax.experimental import pallas as pl
from jax.experimental.pallas import tpu as pltpu

_LN_EPS = 1e-5
_INV_SQRT2 = 0.7071067811865475244
_LANE = 128


def _round_up(x, m):
    return (x + m - 1) // m * m


def _gelu_exact(x):
    # torch.nn.GELU default (erf-based, exact).
    return 0.5 * x * (1.0 + jax.lax.erf(x * _INV_SQRT2))


def _layernorm(x, w, b):
    mu = jnp.mean(x, axis=-1, keepdims=True)
    var = jnp.mean((x - mu) ** 2, axis=-1, keepdims=True)
    return (x - mu) * jax.lax.rsqrt(var + _LN_EPS) * w + b


def _layernorm_lanepad(x, gamma, beta, true_dim):
    """LayerNorm over a lane-padded feature dim.

    Assumes padded lanes of x are zero; gamma/beta are zero in padded lanes so the
    output stays zero there too.  Divides by the true dim, masks pad lanes for var.
    """
    dp = x.shape[-1]
    inv_d = 1.0 / float(true_dim)
    mu = jnp.sum(x, axis=-1, keepdims=True) * inv_d
    xc = x - mu
    if true_dim != dp:
        lane = jax.lax.broadcasted_iota(jnp.int32, (1, dp), 1)
        xc = xc * (lane < true_dim).astype(x.dtype)
    var = jnp.sum(xc * xc, axis=-1, keepdims=True) * inv_d
    return xc * jax.lax.rsqrt(var + _LN_EPS) * gamma + beta


# --------------------------------------------------------------------------
# Kernels
# --------------------------------------------------------------------------

def embed_kernel(x_ref, w_ref, b_ref, o_ref):
    # o = x @ W^T + b   (W pre-transposed + lane-padded to [in_dim, Dp], bf16)
    o_ref[...] = (
        jnp.dot(x_ref[...].astype(jnp.bfloat16), w_ref[...],
                preferred_element_type=jnp.float32)
        + b_ref[...]
    )


def node_precompute_kernel(h_ref, pos_ref, whr_ref, whc_ref, wp_ref, bm_ref,
                           a_ref, b_ref):
    # a = h@Whr + pos@Wp + bm,  b = h@Whc - pos@Wp    (message weights folded per node)
    h = h_ref[...].astype(jnp.bfloat16)
    pw = jnp.dot(pos_ref[...].astype(jnp.bfloat16), wp_ref[...],
                 preferred_element_type=jnp.float32)
    a = jnp.dot(h, whr_ref[...], preferred_element_type=jnp.float32) + pw + bm_ref[...]
    b = jnp.dot(h, whc_ref[...], preferred_element_type=jnp.float32) - pw
    a_ref[...] = a.astype(jnp.bfloat16)
    b_ref[...] = b.astype(jnp.bfloat16)


def edge_kernel(a_ref, b_ref, row_ref, col_ref, w_ref, lnm_w_ref, lnm_b_ref,
                agg_ref, *, true_dim):
    e = pl.program_id(0)
    n_nodes = a_ref.shape[0]

    row = row_ref[0]          # [1, Et] int32, lane-major (sentinel == Np for pads)
    col = col_ref[0]          # [1, Et] int32
    w = w_ref[0]              # [1, Et] f32, 1/deg(receiver); 0 for padded edges

    et = row.shape[-1]
    node_iota = jax.lax.broadcasted_iota(jnp.int32, (n_nodes, et), 0)

    # Node-major one-hot masks [Np, Et] (edge index on the lane dim).
    m_row = (node_iota == row).astype(jnp.bfloat16)
    eq_col = node_iota == col
    m_colg = eq_col.astype(jnp.bfloat16)
    # Mean weight folded into the scatter mask (no [N,1] inv_cnt / finalize mult).
    m_cols = jnp.where(eq_col, w, 0.0).astype(jnp.bfloat16)

    # Gathers: contract the node dim (dim 0 of both operands) -> [Et, Dp].
    dn = (((0,), (0,)), ((), ()))
    ga = jax.lax.dot_general(m_row, a_ref[...], dn, preferred_element_type=jnp.float32)
    gb = jax.lax.dot_general(m_colg, b_ref[...], dn, preferred_element_type=jnp.float32)

    # m_pre = a[row] + b[col]  (== h[row]@Whr + h[col]@Whc + (pos[row]-pos[col])@Wp + bm)
    m = _gelu_exact(ga + gb)
    m = _layernorm_lanepad(m, lnm_w_ref[...], lnm_b_ref[...], true_dim)

    @pl.when(e == 0)
    def _():
        agg_ref[...] = jnp.zeros_like(agg_ref)

    # Scatter-add (natural orientation: contraction over the edge lane dim).
    agg_ref[...] += jnp.dot(m_cols, m.astype(jnp.bfloat16),
                            preferred_element_type=jnp.float32)


def node_update_kernel(h_ref, agg_ref, wuh_ref, wua_ref, bu_ref, lnu_w_ref,
                       lnu_b_ref, o_ref, *, true_dim):
    h = h_ref[...]
    u = (
        jnp.dot(h.astype(jnp.bfloat16), wuh_ref[...],
                preferred_element_type=jnp.float32)
        + jnp.dot(agg_ref[...].astype(jnp.bfloat16), wua_ref[...],
                  preferred_element_type=jnp.float32)
        + bu_ref[...]
    )
    u = _layernorm_lanepad(u, lnu_w_ref[...], lnu_b_ref[...], true_dim)
    o_ref[...] = h + u


# --------------------------------------------------------------------------
# Wrapper
# --------------------------------------------------------------------------

def _pad2(w, rows, cols):
    return jnp.pad(w, ((0, rows - w.shape[0]), (0, cols - w.shape[1])))


def erwin_embedding_forward(x, pos, edge_index, params, *, e_tile=None):
    N, in_dim = x.shape
    P = pos.shape[1]
    dim = params["embed_w"].shape[0]
    dp = _round_up(dim, _LANE)                      # lane-padded feature dim

    tn = min(256, _round_up(N, 8))                  # node tile (multiple of 8)
    np_ = _round_up(N, tn)
    n_blocks = np_ // tn

    x_p = jnp.pad(x, ((0, np_ - N), (0, 0)))
    pos_p = jnp.pad(pos, ((0, np_ - N), (0, 0)))

    row_spec = lambda i: (i, 0)
    const2 = lambda i: (0, 0)
    parallel = pltpu.CompilerParams(dimension_semantics=("parallel",))

    # ---- Linear embedding (N-parallel grid) ----
    w_e = _pad2(params["embed_w"].T, in_dim, dp).astype(jnp.bfloat16)
    b_e = _pad2(params["embed_b"][None, :], 1, dp)

    h = pl.pallas_call(
        embed_kernel,
        out_shape=jax.ShapeDtypeStruct((np_, dp), jnp.float32),
        grid=(n_blocks,),
        in_specs=[
            pl.BlockSpec((tn, in_dim), row_spec),
            pl.BlockSpec((in_dim, dp), const2),
            pl.BlockSpec((1, dp), const2),
        ],
        out_specs=pl.BlockSpec((tn, dp), row_spec),
        compiler_params=parallel,
    )(x_p, w_e, b_e)

    if not params["steps"]:
        return h[:N, :dim]

    # ---- edge prep: lane-major index / weight blocks, out-of-range sentinel pad ----
    E = edge_index.shape[1]
    row = edge_index[0].astype(jnp.int32)
    col = edge_index[1].astype(jnp.int32)

    deg = jnp.zeros((np_,), jnp.float32).at[col].add(1.0)
    w_edge = (1.0 / jnp.maximum(deg, 1.0))[col]            # [E] per-edge mean weight

    # e_tile from VMEM headroom for the [Np, Et] mask temporaries (~8 B/elem).
    if e_tile is None:
        e_tile = ((12 << 20) // (8 * np_)) // _LANE * _LANE
    e_tile = int(max(_LANE, min(int(e_tile), 1024, _round_up(E, _LANE))))
    num_eb = pl.cdiv(E, e_tile)
    ep = num_eb * e_tile
    pad_e = ep - E

    def _edge_arr(v, fill, dtype):
        v = jnp.concatenate([v.astype(dtype), jnp.full((pad_e,), fill, dtype)])
        return v.reshape(num_eb, 1, e_tile)

    row_p = _edge_arr(row, np_, jnp.int32)                  # sentinel = Np (matches nothing)
    col_p = _edge_arr(col, np_, jnp.int32)
    w_p = _edge_arr(w_edge, 0.0, jnp.float32)

    # Edge-kernel VMEM budget derived from shapes (resident a/b/agg + mask temporaries).
    resident = 2 * (2 * np_ * dp * 2 + np_ * dp * 4)
    transient = 8 * e_tile * np_ + 16 * e_tile * dp
    edge_vmem = int(min(max(resident + transient + (8 << 20), 32 << 20), 96 << 20))

    edge_spec = pl.BlockSpec((1, 1, e_tile), lambda e: (e, 0, 0))
    full_nd = pl.BlockSpec((np_, dp), lambda e: (0, 0))
    vec_spec = pl.BlockSpec((1, dp), lambda e: (0, 0))

    precompute_call = pl.pallas_call(
        node_precompute_kernel,
        out_shape=(jax.ShapeDtypeStruct((np_, dp), jnp.bfloat16),
                   jax.ShapeDtypeStruct((np_, dp), jnp.bfloat16)),
        grid=(n_blocks,),
        in_specs=[
            pl.BlockSpec((tn, dp), row_spec),
            pl.BlockSpec((tn, P), row_spec),
            pl.BlockSpec((dp, dp), const2),
            pl.BlockSpec((dp, dp), const2),
            pl.BlockSpec((P, dp), const2),
            pl.BlockSpec((1, dp), const2),
        ],
        out_specs=(pl.BlockSpec((tn, dp), row_spec),
                   pl.BlockSpec((tn, dp), row_spec)),
        compiler_params=parallel,
    )

    edge_call = pl.pallas_call(
        functools.partial(edge_kernel, true_dim=dim),
        out_shape=jax.ShapeDtypeStruct((np_, dp), jnp.float32),
        grid=(num_eb,),
        in_specs=[full_nd, full_nd, edge_spec, edge_spec, edge_spec,
                  vec_spec, vec_spec],
        out_specs=pl.BlockSpec((np_, dp), lambda e: (0, 0)),
        compiler_params=pltpu.CompilerParams(
            dimension_semantics=("arbitrary",),          # E is a reduction axis
            vmem_limit_bytes=edge_vmem,
        ),
    )

    update_call = pl.pallas_call(
        functools.partial(node_update_kernel, true_dim=dim),
        out_shape=jax.ShapeDtypeStruct((np_, dp), jnp.float32),
        grid=(n_blocks,),
        in_specs=[
            pl.BlockSpec((tn, dp), row_spec),
            pl.BlockSpec((tn, dp), row_spec),
            pl.BlockSpec((dp, dp), const2),
            pl.BlockSpec((dp, dp), const2),
            pl.BlockSpec((1, dp), const2),
            pl.BlockSpec((1, dp), const2),
            pl.BlockSpec((1, dp), const2),
        ],
        out_specs=pl.BlockSpec((tn, dp), row_spec),
        input_output_aliases={0: 0},                     # h updated in place
        compiler_params=parallel,
    )

    for sp in params["steps"]:
        wm = sp["msg_w"]                                  # [dim, 2*dim + P]
        wu = sp["upd_w"]                                  # [dim, 2*dim]
        whr = _pad2(wm[:, :dim].T, dp, dp).astype(jnp.bfloat16)
        whc = _pad2(wm[:, dim:2 * dim].T, dp, dp).astype(jnp.bfloat16)
        wp = _pad2(wm[:, 2 * dim:].T, P, dp).astype(jnp.bfloat16)
        bm = _pad2(sp["msg_b"][None, :], 1, dp)
        lnm_w = _pad2(sp["msg_ln_w"][None, :], 1, dp)
        lnm_b = _pad2(sp["msg_ln_b"][None, :], 1, dp)
        wuh = _pad2(wu[:, :dim].T, dp, dp).astype(jnp.bfloat16)
        wua = _pad2(wu[:, dim:].T, dp, dp).astype(jnp.bfloat16)
        bu = _pad2(sp["upd_b"][None, :], 1, dp)
        lnu_w = _pad2(sp["upd_ln_w"][None, :], 1, dp)
        lnu_b = _pad2(sp["upd_ln_b"][None, :], 1, dp)

        a, b = precompute_call(h, pos_p, whr, whc, wp, bm)
        agg = edge_call(a, b, row_p, col_p, w_p, lnm_w, lnm_b)
        h = update_call(h, agg, wuh, wua, bu, lnu_w, lnu_b)

    return h[:N, :dim]


# --------------------------------------------------------------------------
# Pure-JAX reference (matches the PyTorch semantics)
# --------------------------------------------------------------------------

def reference_forward(x, pos, edge_index, params):
    dim = params["embed_w"].shape[0]
    N = x.shape[0]
    h = x @ params["embed_w"].T + params["embed_b"]
    row, col = edge_index[0], edge_index[1]
    edge_attr = pos[row] - pos[col]
    for sp in params["steps"]:
        msg_in = jnp.concatenate([h[row], h[col], edge_attr], axis=-1)
        m = msg_in @ sp["msg_w"].T + sp["msg_b"]
        m = _gelu_exact(m)
        m = _layernorm(m, sp["msg_ln_w"], sp["msg_ln_b"])
        agg_sum = jnp.zeros((N, dim), m.dtype).at[col].add(m)
        cnt = jnp.zeros((N,), m.dtype).at[col].add(1.0)
        agg = agg_sum / jnp.maximum(cnt, 1.0)[:, None]
        u = jnp.concatenate([h, agg], axis=-1) @ sp["upd_w"].T + sp["upd_b"]
        u = _layernorm(u, sp["upd_ln_w"], sp["upd_ln_b"])
        h = h + u
    return h


def init_params(key, in_dim, dim, mp_steps, dimensionality):
    """Deterministic synthetic parameters with the module's shapes."""

    def linear(k, fan_in, fan_out):
        kw_, kb_ = jax.random.split(k)
        scale = 1.0 / jnp.sqrt(float(fan_in))
        w = jax.random.uniform(kw_, (fan_out, fan_in), jnp.float32, -scale, scale)
        b = jax.random.uniform(kb_, (fan_out,), jnp.float32, -scale, scale)
        return w, b

    keys = jax.random.split(key, 1 + mp_steps)
    ew, eb = linear(keys[0], in_dim, dim)
    steps = []
    for s in range(mp_steps):
        k1, k2, k3, k4 = jax.random.split(keys[1 + s], 4)
        mw, mb = linear(k1, 2 * dim + dimensionality, dim)
        uw, ub = linear(k2, 2 * dim, dim)
        steps.append(dict(
            msg_w=mw, msg_b=mb,
            msg_ln_w=1.0 + 0.1 * jax.random.normal(k3, (dim,), jnp.float32),
            msg_ln_b=0.1 * jax.random.normal(jax.random.fold_in(k3, 1), (dim,), jnp.float32),
            upd_w=uw, upd_b=ub,
            upd_ln_w=1.0 + 0.1 * jax.random.normal(k4, (dim,), jnp.float32),
            upd_ln_b=0.1 * jax.random.normal(jax.random.fold_in(k4, 1), (dim,), jnp.float32),
        ))
    return dict(embed_w=ew, embed_b=eb, steps=steps)


if __name__ == "__main__":
    N, in_dim, dim, E, mp_steps, P = 16, 8, 32, 64, 2, 3

    key = jax.random.PRNGKey(0)
    kx, kp, ke, kw = jax.random.split(key, 4)
    x = jax.random.normal(kx, (N, in_dim), jnp.float32)
    pos = jax.random.normal(kp, (N, P), jnp.float32)
    edge_index = jax.random.randint(ke, (2, E), 0, N, jnp.int32)
    params = init_params(kw, in_dim, dim, mp_steps, P)

    fwd = jax.jit(erwin_embedding_forward)
    out = jax.block_until_ready(fwd(x, pos, edge_index, params))

    ref = reference_forward(x, pos, edge_index, params)
    assert out.shape == (N, dim), out.shape
    max_err = float(jnp.max(jnp.abs(out - ref)))
    assert bool(jnp.allclose(out, ref, rtol=2e-2, atol=2e-2)), max_err
    print("KERNEL_OK")
</pallas_src>

<mosaic_0001>
module attributes {stable_mosaic.version = 11 : i64} {
  func.func private @main(%arg0: i32) attributes {dimension_semantics = [#tpu.dimension_semantics<core_parallel>], iteration_bounds = array<i64: 2>, tpu.core_type = #tpu.core_type<sc_scalar_subcore>, window_params = []} {
    return
  }
}

module attributes {stable_mosaic.version = 11 : i64} {
  func.func private @main(%arg0: i32) attributes {dimension_semantics = [#tpu.dimension_semantics<core_parallel>], iteration_bounds = array<i64: 2>, tpu.core_type = #tpu.core_type<sc_scalar_subcore>, window_params = []} {
    return
  }
}

module attributes {stable_mosaic.version = 11 : i64} {
  func.func @embed_kernel(%arg0: i32, %arg1: memref<16x8xf32, #tpu.memory_space<vmem>>, %arg2: memref<8x128xbf16, #tpu.memory_space<vmem>>, %arg3: memref<1x128xf32, #tpu.memory_space<vmem>>, %arg4: memref<16x128xf32, #tpu.memory_space<vmem>>) attributes {dimension_semantics = [#tpu.dimension_semantics<parallel>], iteration_bounds = array<i64: 1>, scalar_prefetch = 0 : i64, scratch_operands = 0 : i64, tpu.core_type = #tpu.core_type<tc>, window_params = [{transform_indices = @transform_0, window_bounds = array<i64: 16, 8>}, {pipeline_mode = #tpu.pipeline_mode<synchronous>, transform_indices = @transform_1, window_bounds = array<i64: 8, 128>}, {pipeline_mode = #tpu.pipeline_mode<synchronous>, transform_indices = @transform_2, window_bounds = array<i64: 1, 128>}, {transform_indices = @transform_3, window_bounds = array<i64: 16, 128>}]} {
    %c0 = arith.constant 0 : index
    %c0_0 = arith.constant 0 : index
    %0 = vector.load %arg1[%c0, %c0_0] : memref<16x8xf32, #tpu.memory_space<vmem>>, vector<16x8xf32>
    %1 = arith.truncf %0 : vector<16x8xf32> to vector<16x8xbf16>
    %c0_1 = arith.constant 0 : index
    %c0_2 = arith.constant 0 : index
    %2 = vector.load %arg2[%c0_1, %c0_2] : memref<8x128xbf16, #tpu.memory_space<vmem>>, vector<8x128xbf16>
    %cst = arith.constant dense<0.000000e+00> : vector<16x128xf32>
    %3 = tpu.matmul %1, %2, %cst {dimension_numbers = #tpu.dot_dimension_numbers<[1], [0], [0], [1], [0, 0, 1, 1], [], []>} : vector<16x8xbf16>, vector<8x128xbf16>, vector<16x128xf32> -> vector<16x128xf32>
    %c0_3 = arith.constant 0 : index
    %c0_4 = arith.constant 0 : index
    %4 = vector.load %arg3[%c0_3, %c0_4] : memref<1x128xf32, #tpu.memory_space<vmem>>, vector<1x128xf32>
    %5 = vector.broadcast %4 : vector<1x128xf32> to vector<16x128xf32>
    %6 = arith.addf %3, %5 : vector<16x128xf32>
    %c0_5 = arith.constant 0 : index
    %c0_6 = arith.constant 0 : index
    %7 = vector.load %arg4[%c0_5, %c0_6] : memref<16x128xf32, #tpu.memory_space<vmem>>, vector<16x128xf32>
    tpu.vector_store %arg4[%c0_5, %c0_6], %6 {strides = array<i32>} : memref<16x128xf32, #tpu.memory_space<vmem>>, vector<16x128xf32>,
    return
  }
  func.func @transform_0(%arg0: i32) -> (i32, i32) {
    %c0_i32 = arith.constant 0 : i32
    %c0_i32_0 = arith.constant 0 : i32
    return %arg0, %c0_i32 : i32, i32
  }
  func.func @transform_1(%arg0: i32) -> (i32, i32) {
    %c0_i32 = arith.constant 0 : i32
    %c0_i32_0 = arith.constant 0 : i32
    %c0_i32_1 = arith.constant 0 : i32
    return %c0_i32, %c0_i32_0 : i32, i32
  }
  func.func @transform_2(%arg0: i32) -> (i32, i32) {
    %c0_i32 = arith.constant 0 : i32
    %c0_i32_0 = arith.constant 0 : i32
    %c0_i32_1 = arith.constant 0 : i32
    return %c0_i32, %c0_i32_0 : i32, i32
  }
  func.func @transform_3(%arg0: i32) -> (i32, i32) {
    %c0_i32 = arith.constant 0 : i32
    %c0_i32_0 = arith.constant 0 : i32
    return %arg0, %c0_i32 : i32, i32
  }
}

module attributes {stable_mosaic.version = 11 : i64} {
  func.func @node_precompute_kernel(%arg0: i32, %arg1: memref<16x128xf32, #tpu.memory_space<vmem>>, %arg2: memref<16x3xf32, #tpu.memory_space<vmem>>, %arg3: memref<128x128xbf16, #tpu.memory_space<vmem>>, %arg4: memref<128x128xbf16, #tpu.memory_space<vmem>>, %arg5: memref<3x128xbf16, #tpu.memory_space<vmem>>, %arg6: memref<1x128xf32, #tpu.memory_space<vmem>>, %arg7: memref<16x128xbf16, #tpu.memory_space<vmem>>, %arg8: memref<16x128xbf16, #tpu.memory_space<vmem>>) attributes {dimension_semantics = [#tpu.dimension_semantics<parallel>], iteration_bounds = array<i64: 1>, scalar_prefetch = 0 : i64, scratch_operands = 0 : i64, tpu.core_type = #tpu.core_type<tc>, window_params = [{transform_indices = @transform_0, window_bounds = array<i64: 16, 128>}, {transform_indices = @transform_1, window_bounds = array<i64: 16, 3>}, {pipeline_mode = #tpu.pipeline_mode<synchronous>, transform_indices = @transform_2, window_bounds = array<i64: 128, 128>}, {pipeline_mode = #tpu.pipeline_mode<synchronous>, transform_indices = @transform_3, window_bounds = array<i64: 128, 128>}, {pipeline_mode = #tpu.pipeline_mode<synchronous>, transform_indices = @transform_4, window_bounds = array<i64: 3, 128>}, {pipeline_mode = #tpu.pipeline_mode<synchronous>, transform_indices = @transform_5, window_bounds = array<i64: 1, 128>}, {transform_indices = @transform_6, window_bounds = array<i64: 16, 128>}, {transform_indices = @transform_7, window_bounds = array<i64: 16, 128>}]} {
    %c0 = arith.constant 0 : index
    %c0_0 = arith.constant 0 : index
    %0 = vector.load %arg1[%c0, %c0_0] : memref<16x128xf32, #tpu.memory_space<vmem>>, vector<16x128xf32>
    %1 = arith.truncf %0 : vector<16x128xf32> to vector<16x128xbf16>
    %c0_1 = arith.constant 0 : index
    %c0_2 = arith.constant 0 : index
    %2 = vector.load %arg2[%c0_1, %c0_2] : memref<16x3xf32, #tpu.memory_space<vmem>>, vector<16x3xf32>
    %3 = arith.truncf %2 : vector<16x3xf32> to vector<16x3xbf16>
    %c0_3 = arith.constant 0 : index
    %c0_4 = arith.constant 0 : index
    %4 = vector.load %arg5[%c0_3, %c0_4] : memref<3x128xbf16, #tpu.memory_space<vmem>>, vector<3x128xbf16>
    %cst = arith.constant dense<0.000000e+00> : vector<16x128xf32>
    %5 = tpu.matmul %3, %4, %cst {dimension_numbers = #tpu.dot_dimension_numbers<[1], [0], [0], [1], [0, 0, 1, 1], [], []>} : vector<16x3xbf16>, vector<3x128xbf16>, vector<16x128xf32> -> vector<16x128xf32>
    %c0_5 = arith.constant 0 : index
    %c0_6 = arith.constant 0 : index
    %6 = vector.load %arg3[%c0_5, %c0_6] : memref<128x128xbf16, #tpu.memory_space<vmem>>, vector<128x128xbf16>
    %cst_7 = arith.constant dense<0.000000e+00> : vector<16x128xf32>
    %7 = tpu.matmul %1, %6, %cst_7 {dimension_numbers = #tpu.dot_dimension_numbers<[1], [0], [0], [1], [0, 0, 1, 1], [], []>} : vector<16x128xbf16>, vector<128x128xbf16>, vector<16x128xf32> -> vector<16x128xf32>
    %8 = arith.addf %7, %5 : vector<16x128xf32>
    %c0_8 = arith.constant 0 : index
    %c0_9 = arith.constant 0 : index
    %9 = vector.load %arg6[%c0_8, %c0_9] : memref<1x128xf32, #tpu.memory_space<vmem>>, vector<1x128xf32>
    %10 = vector.broadcast %9 : vector<1x128xf32> to vector<16x128xf32>
    %11 = arith.addf %8, %10 : vector<16x128xf32>
    %c0_10 = arith.constant 0 : index
    %c0_11 = arith.constant 0 : index
    %12 = vector.load %arg4[%c0_10, %c0_11] : memref<128x128xbf16, #tpu.memory_space<vmem>>, vector<128x128xbf16>
    %cst_12 = arith.constant dense<0.000000e+00> : vector<16x128xf32>
    %13 = tpu.matmul %1, %12, %cst_12 {dimension_numbers = #tpu.dot_dimension_numbers<[1], [0], [0], [1], [0, 0, 1, 1], [], []>} : vector<16x128xbf16>, vector<128x128xbf16>, vector<16x128xf32> -> vector<16x128xf32>
    %14 = arith.subf %13, %5 : vector<16x128xf32>
    %15 = arith.truncf %11 : vector<16x128xf32> to vector<16x128xbf16>
    %c0_13 = arith.constant 0 : index
    %c0_14 = arith.constant 0 : index
    %16 = vector.load %arg7[%c0_13, %c0_14] : memref<16x128xbf16, #tpu.memory_space<vmem>>, vector<16x128xbf16>
    tpu.vector_store %arg7[%c0_13, %c0_14], %15 {strides = array<i32>} : memref<16x128xbf16, #tpu.memory_space<vmem>>, vector<16x128xbf16>,
    %17 = arith.truncf %14 : vector<16x128xf32> to vector<16x128xbf16>
    %c0_15 = arith.constant 0 : index
    %c0_16 = arith.constant 0 : index
    %18 = vector.load %arg8[%c0_15, %c0_16] : memref<16x128xbf16, #tpu.memory_space<vmem>>, vector<16x128xbf16>
    tpu.vector_store %arg8[%c0_15, %c0_16], %17 {strides = array<i32>} : memref<16x128xbf16, #tpu.memory_space<vmem>>, vector<16x128xbf16>,
    return
  }
  func.func @transform_0(%arg0: i32) -> (i32, i32) {
    %c0_i32 = arith.constant 0 : i32
    %c0_i32_0 = arith.constant 0 : i32
    return %arg0, %c0_i32 : i32, i32
  }
  func.func @transform_1(%arg0: i32) -> (i32, i32) {
    %c0_i32 = arith.constant 0 : i32
    %c0_i32_0 = arith.constant 0 : i32
    return %arg0, %c0_i32 : i32, i32
  }
  func.func @transform_2(%arg0: i32) -> (i32, i32) {
    %c0_i32 = arith.constant 0 : i32
    %c0_i32_0 = arith.constant 0 : i32
    %c0_i32_1 = arith.constant 0 : i32
    return %c0_i32, %c0_i32_0 : i32, i32
  }
  func.func @transform_3(%arg0: i32) -> (i32, i32) {
    %c0_i32 = arith.constant 0 : i32
    %c0_i32_0 = arith.constant 0 : i32
    %c0_i32_1 = arith.constant 0 : i32
    return %c0_i32, %c0_i32_0 : i32, i32
  }
  func.func @transform_4(%arg0: i32) -> (i32, i32) {
    %c0_i32 = arith.constant 0 : i32
    %c0_i32_0 = arith.constant 0 : i32
    %c0_i32_1 = arith.constant 0 : i32
    return %c0_i32, %c0_i32_0 : i32, i32
  }
  func.func @transform_5(%arg0: i32) -> (i32, i32) {
    %c0_i32 = arith.constant 0 : i32
    %c0_i32_0 = arith.constant 0 : i32
    %c0_i32_1 = arith.constant 0 : i32
    return %c0_i32, %c0_i32_0 : i32, i32
  }
  func.func @transform_6(%arg0: i32) -> (i32, i32) {
    %c0_i32 = arith.constant 0 : i32
    %c0_i32_0 = arith.constant 0 : i32
    return %arg0, %c0_i32 : i32, i32
  }
  func.func @transform_7(%arg0: i32) -> (i32, i32) {
    %c0_i32 = arith.constant 0 : i32
    %c0_i32_0 = arith.constant 0 : i32
    return %arg0, %c0_i32 : i32, i32
  }
}

module attributes {stable_mosaic.version = 11 : i64} {
  func.func @edge_kernel(%arg0: i32, %arg1: memref<16x128xbf16, #tpu.memory_space<vmem>>, %arg2: memref<16x128xbf16, #tpu.memory_space<vmem>>, %arg3: memref<1x1x128xi32, #tpu.memory_space<vmem>>, %arg4: memref<1x1x128xi32, #tpu.memory_space<vmem>>, %arg5: memref<1x1x128xf32, #tpu.memory_space<vmem>>, %arg6: memref<1x128xf32, #tpu.memory_space<vmem>>, %arg7: memref<1x128xf32, #tpu.memory_space<vmem>>, %arg8: memref<16x128xf32, #tpu.memory_space<vmem>>) attributes {dimension_semantics = [#tpu.dimension_semantics<arbitrary>], iteration_bounds = array<i64: 1>, scalar_prefetch = 0 : i64, scratch_operands = 0 : i64, tpu.core_type = #tpu.core_type<tc>, window_params = [{pipeline_mode = #tpu.pipeline_mode<synchronous>, transform_indices = @transform_0, window_bounds = array<i64: 16, 128>}, {pipeline_mode = #tpu.pipeline_mode<synchronous>, transform_indices = @transform_1, window_bounds = array<i64: 16, 128>}, {transform_indices = @transform_2, window_bounds = array<i64: 1, 1, 128>}, {transform_indices = @transform_3, window_bounds = array<i64: 1, 1, 128>}, {transform_indices = @transform_4, window_bounds = array<i64: 1, 1, 128>}, {pipeline_mode = #tpu.pipeline_mode<synchronous>, transform_indices = @transform_5, window_bounds = array<i64: 1, 128>}, {pipeline_mode = #tpu.pipeline_mode<synchronous>, transform_indices = @transform_6, window_bounds = array<i64: 1, 128>}, {pipeline_mode = #tpu.pipeline_mode<synchronous>, transform_indices = @transform_7, window_bounds = array<i64: 16, 128>}]} {
    %c0 = arith.constant 0 : index
    %c0_0 = arith.constant 0 : index
    %c0_1 = arith.constant 0 : index
    %0 = vector.load %arg3[%c0, %c0_0, %c0_1] : memref<1x1x128xi32, #tpu.memory_space<vmem>>, vector<1x1x128xi32>
    %1 = vector.shape_cast %0 : vector<1x1x128xi32> to vector<1x128xi32>
    %c0_2 = arith.constant 0 : index
    %c0_3 = arith.constant 0 : index
    %c0_4 = arith.constant 0 : index
    %2 = vector.load %arg4[%c0_2, %c0_3, %c0_4] : memref<1x1x128xi32, #tpu.memory_space<vmem>>, vector<1x1x128xi32>
    %3 = vector.shape_cast %2 : vector<1x1x128xi32> to vector<1x128xi32>
    %c0_5 = arith.constant 0 : index
    %c0_6 = arith.constant 0 : index
    %c0_7 = arith.constant 0 : index
    %4 = vector.load %arg5[%c0_5, %c0_6, %c0_7] : memref<1x1x128xf32, #tpu.memory_space<vmem>>, vector<1x1x128xf32>
    %5 = vector.shape_cast %4 : vector<1x1x128xf32> to vector<1x128xf32>
    %6 = tpu.iota {dimensions = array<i32: 0>} : vector<16x128xi32>
    %7 = vector.broadcast %1 : vector<1x128xi32> to vector<16x128xi32>
    %8 = arith.cmpi eq, %6, %7 : vector<16x128xi32>
    %9 = arith.extui %8 : vector<16x128xi1> to vector<16x128xi32>
    %10 = arith.sitofp %9 : vector<16x128xi32> to vector<16x128xf32>
    %11 = arith.truncf %10 : vector<16x128xf32> to vector<16x128xbf16>
    %12 = vector.broadcast %3 : vector<1x128xi32> to vector<16x128xi32>
    %13 = arith.cmpi eq, %6, %12 : vector<16x128xi32>
    %14 = arith.extui %13 : vector<16x128xi1> to vector<16x128xi32>
    %15 = arith.sitofp %14 : vector<16x128xi32> to vector<16x128xf32>
    %16 = arith.truncf %15 : vector<16x128xf32> to vector<16x128xbf16>
    %cst = arith.constant 0.000000e+00 : f32
    %17 = vector.shape_cast %5 : vector<1x128xf32> to vector<1x128xf32>
    %18 = vector.broadcast %17 : vector<1x128xf32> to vector<16x128xf32>
    %19 = vector.broadcast %cst : f32 to vector<16x128xf32>
    %20 = arith.select %13, %18, %19 : vector<16x128xi1>, vector<16x128xf32>
    %21 = arith.truncf %20 : vector<16x128xf32> to vector<16x128xbf16>
    %c0_8 = arith.constant 0 : index
    %c0_9 = arith.constant 0 : index
    %22 = vector.load %arg1[%c0_8, %c0_9] : memref<16x128xbf16, #tpu.memory_space<vmem>>, vector<16x128xbf16>
    %cst_10 = arith.constant dense<0.000000e+00> : vector<128x128xf32>
    %23 = tpu.matmul %11, %22, %cst_10 {dimension_numbers = #tpu.dot_dimension_numbers<[0], [0], [1], [1], [0, 1, 1, 1], [], []>} : vector<16x128xbf16>, vector<16x128xbf16>, vector<128x128xf32> -> vector<128x128xf32>
    %c0_11 = arith.constant 0 : index
    %c0_12 = arith.constant 0 : index
    %24 = vector.load %arg2[%c0_11, %c0_12] : memref<16x128xbf16, #tpu.memory_space<vmem>>, vector<16x128xbf16>
    %cst_13 = arith.constant dense<0.000000e+00> : vector<128x128xf32>
    %25 = tpu.matmul %16, %24, %cst_13 {dimension_numbers = #tpu.dot_dimension_numbers<[0], [0], [1], [1], [0, 1, 1, 1], [], []>} : vector<16x128xbf16>, vector<16x128xbf16>, vector<128x128xf32> -> vector<128x128xf32>
    %26 = arith.addf %23, %25 : vector<128x128xf32>
    %cst_14 = arith.constant 5.000000e-01 : f32
    %27 = vector.broadcast %cst_14 : f32 to vector<128x128xf32>
    %28 = arith.mulf %27, %26 : vector<128x128xf32>
    %cst_15 = arith.constant 0.707106769 : f32
    %29 = vector.broadcast %cst_15 : f32 to vector<128x128xf32>
    %30 = arith.mulf %26, %29 : vector<128x128xf32>
    %31 = math.erf %30 : vector<128x128xf32>
    %cst_16 = arith.constant 1.000000e+00 : f32
    %32 = vector.broadcast %cst_16 : f32 to vector<128x128xf32>
    %33 = arith.addf %32, %31 : vector<128x128xf32>
    %34 = arith.mulf %28, %33 : vector<128x128xf32>
    %c0_17 = arith.constant 0 : index
    %c0_18 = arith.constant 0 : index
    %35 = vector.load %arg6[%c0_17, %c0_18] : memref<1x128xf32, #tpu.memory_space<vmem>>, vector<1x128xf32>
    %c0_19 = arith.constant 0 : index
    %c0_20 = arith.constant 0 : index
    %36 = vector.load %arg7[%c0_19, %c0_20] : memref<1x128xf32, #tpu.memory_space<vmem>>, vector<1x128xf32>
    %cst_21 = arith.constant dense<0.000000e+00> : vector<128xf32>
    %37 = vector.multi_reduction <add>, %34, %cst_21 [1] : vector<128x128xf32> to vector<128xf32>
    %38 = vector.shape_cast %37 : vector<128xf32> to vector<128x1xf32>
    %cst_22 = arith.constant 3.125000e-02 : f32
    %39 = vector.broadcast %cst_22 : f32 to vector<128x1xf32>
    %40 = arith.mulf %38, %39 : vector<128x1xf32>
    %41 = vector.broadcast %40 : vector<128x1xf32> to vector<128x128xf32>
    %42 = arith.subf %34, %41 : vector<128x128xf32>
    %43 = tpu.iota {dimensions = array<i32: 1>} : vector<1x128xi32>
    %c32_i32 = arith.constant 32 : i32
    %44 = vector.broadcast %c32_i32 : i32 to vector<1x128xi32>
    %45 = arith.cmpi slt, %43, %44 : vector<1x128xi32>
    %46 = arith.extui %45 : vector<1x128xi1> to vector<1x128xi32>
    %47 = arith.sitofp %46 : vector<1x128xi32> to vector<1x128xf32>
    %48 = vector.broadcast %47 : vector<1x128xf32> to vector<128x128xf32>
    %49 = arith.mulf %42, %48 : vector<128x128xf32>
    %50 = arith.mulf %49, %49 : vector<128x128xf32>
    %cst_23 = arith.constant dense<0.000000e+00> : vector<128xf32>
    %51 = vector.multi_reduction <add>, %50, %cst_23 [1] : vector<128x128xf32> to vector<128xf32>
    %52 = vector.shape_cast %51 : vector<128xf32> to vector<128x1xf32>
    %cst_24 = arith.constant 3.125000e-02 : f32
    %53 = vector.broadcast %cst_24 : f32 to vector<128x1xf32>
    %54 = arith.mulf %52, %53 : vector<128x1xf32>
    %cst_25 = arith.constant 9.99999974E-6 : f32
    %55 = vector.broadcast %cst_25 : f32 to vector<128x1xf32>
    %56 = arith.addf %54, %55 : vector<128x1xf32>
    %57 = math.rsqrt %56 : vector<128x1xf32>
    %58 = vector.broadcast %57 : vector<128x1xf32> to vector<128x128xf32>
    %59 = arith.mulf %49, %58 : vector<128x128xf32>
    %60 = vector.broadcast %35 : vector<1x128xf32> to vector<128x128xf32>
    %61 = arith.mulf %59, %60 : vector<128x128xf32>
    %62 = vector.broadcast %36 : vector<1x128xf32> to vector<128x128xf32>
    %63 = arith.addf %61, %62 : vector<128x128xf32>
    %c0_i32 = arith.constant 0 : i32
    %64 = arith.cmpi eq, %arg0, %c0_i32 : i32
    %65 = arith.extui %64 : i1 to i32
    %c0_i32_26 = arith.constant 0 : i32
    %66 = arith.cmpi ne, %65, %c0_i32_26 : i32
    scf.if %66 {
      %cst_32 = arith.constant 0.000000e+00 : f32
      %72 = vector.broadcast %cst_32 : f32 to vector<16x128xf32>
      %c0_33 = arith.constant 0 : index
      %c0_34 = arith.constant 0 : index
      %73 = vector.load %arg8[%c0_33, %c0_34] : memref<16x128xf32, #tpu.memory_space<vmem>>, vector<16x128xf32>
      tpu.vector_store %arg8[%c0_33, %c0_34], %72 {strides = array<i32>} : memref<16x128xf32, #tpu.memory_space<vmem>>, vector<16x128xf32>,
    } else {
    }
    %c0_27 = arith.constant 0 : index
    %c0_28 = arith.constant 0 : index
    %67 = vector.load %arg8[%c0_27, %c0_28] : memref<16x128xf32, #tpu.memory_space<vmem>>, vector<16x128xf32>
    %68 = arith.truncf %63 : vector<128x128xf32> to vector<128x128xbf16>
    %cst_29 = arith.constant dense<0.000000e+00> : vector<16x128xf32>
    %69 = tpu.matmul %21, %68, %cst_29 {dimension_numbers = #tpu.dot_dimension_numbers<[1], [0], [0], [1], [0, 0, 1, 1], [], []>} : vector<16x128xbf16>, vector<128x128xbf16>, vector<16x128xf32> -> vector<16x128xf32>
    %70 = arith.addf %67, %69 : vector<16x128xf32>
    %c0_30 = arith.constant 0 : index
    %c0_31 = arith.constant 0 : index
    %71 = vector.load %arg8[%c0_30, %c0_31] : memref<16x128xf32, #tpu.memory_space<vmem>>, vector<16x128xf32>
    tpu.vector_store %arg8[%c0_30, %c0_31], %70 {strides = array<i32>} : memref<16x128xf32, #tpu.memory_space<vmem>>, vector<16x128xf32>,
    return
  }
  func.func @transform_0(%arg0: i32) -> (i32, i32) {
    %c0_i32 = arith.constant 0 : i32
    %c0_i32_0 = arith.constant 0 : i32
    %c0_i32_1 = arith.constant 0 : i32
    return %c0_i32, %c0_i32_0 : i32, i32
  }
  func.func @transform_1(%arg0: i32) -> (i32, i32) {
    %c0_i32 = arith.constant 0 : i32
    %c0_i32_0 = arith.constant 0 : i32
    %c0_i32_1 = arith.constant 0 : i32
    return %c0_i32, %c0_i32_0 : i32, i32
  }
  func.func @transform_2(%arg0: i32) -> (i32, i32, i32) {
    %c0_i32 = arith.constant 0 : i32
    %c0_i32_0 = arith.constant 0 : i32
    %c0_i32_1 = arith.constant 0 : i32
    return %arg0, %c0_i32, %c0_i32_0 : i32, i32, i32
  }
  func.func @transform_3(%arg0: i32) -> (i32, i32, i32) {
    %c0_i32 = arith.constant 0 : i32
    %c0_i32_0 = arith.constant 0 : i32
    %c0_i32_1 = arith.constant 0 : i32
    return %arg0, %c0_i32, %c0_i32_0 : i32, i32, i32
  }
  func.func @transform_4(%arg0: i32) -> (i32, i32, i32) {
    %c0_i32 = arith.constant 0 : i32
    %c0_i32_0 = arith.constant 0 : i32
    %c0_i32_1 = arith.constant 0 : i32
    return %arg0, %c0_i32, %c0_i32_0 : i32, i32, i32
  }
  func.func @transform_5(%arg0: i32) -> (i32, i32) {
    %c0_i32 = arith.constant 0 : i32
    %c0_i32_0 = arith.constant 0 : i32
    %c0_i32_1 = arith.constant 0 : i32
    return %c0_i32, %c0_i32_0 : i32, i32
  }
  func.func @transform_6(%arg0: i32) -> (i32, i32) {
    %c0_i32 = arith.constant 0 : i32
    %c0_i32_0 = arith.constant 0 : i32
    %c0_i32_1 = arith.constant 0 : i32
    return %c0_i32, %c0_i32_0 : i32, i32
  }
  func.func @transform_7(%arg0: i32) -> (i32, i32) {
    %c0_i32 = arith.constant 0 : i32
    %c0_i32_0 = arith.constant 0 : i32
    %c0_i32_1 = arith.constant 0 : i32
    return %c0_i32, %c0_i32_0 : i32, i32
  }
}

module attributes {stable_mosaic.version = 11 : i64} {
  func.func @node_update_kernel(%arg0: i32, %arg1: memref<16x128xf32, #tpu.memory_space<vmem>>, %arg2: memref<16x128xf32, #tpu.memory_space<vmem>>, %arg3: memref<128x128xbf16, #tpu.memory_space<vmem>>, %arg4: memref<128x128xbf16, #tpu.memory_space<vmem>>, %arg5: memref<1x128xf32, #tpu.memory_space<vmem>>, %arg6: memref<1x128xf32, #tpu.memory_space<vmem>>, %arg7: memref<1x128xf32, #tpu.memory_space<vmem>>, %arg8: memref<16x128xf32, #tpu.memory_space<vmem>>) attributes {dimension_semantics = [#tpu.dimension_semantics<parallel>], iteration_bounds = array<i64: 1>, scalar_prefetch = 0 : i64, scratch_operands = 0 : i64, tpu.core_type = #tpu.core_type<tc>, window_params = [{transform_indices = @transform_0, window_bounds = array<i64: 16, 128>}, {transform_indices = @transform_1, window_bounds = array<i64: 16, 128>}, {pipeline_mode = #tpu.pipeline_mode<synchronous>, transform_indices = @transform_2, window_bounds = array<i64: 128, 128>}, {pipeline_mode = #tpu.pipeline_mode<synchronous>, transform_indices = @transform_3, window_bounds = array<i64: 128, 128>}, {pipeline_mode = #tpu.pipeline_mode<synchronous>, transform_indices = @transform_4, window_bounds = array<i64: 1, 128>}, {pipeline_mode = #tpu.pipeline_mode<synchronous>, transform_indices = @transform_5, window_bounds = array<i64: 1, 128>}, {pipeline_mode = #tpu.pipeline_mode<synchronous>, transform_indices = @transform_6, window_bounds = array<i64: 1, 128>}, {transform_indices = @transform_7, window_bounds = array<i64: 16, 128>}]} {
    %c0 = arith.constant 0 : index
    %c0_0 = arith.constant 0 : index
    %0 = vector.load %arg1[%c0, %c0_0] : memref<16x128xf32, #tpu.memory_space<vmem>>, vector<16x128xf32>
    %1 = arith.truncf %0 : vector<16x128xf32> to vector<16x128xbf16>
    %c0_1 = arith.constant 0 : index
    %c0_2 = arith.constant 0 : index
    %2 = vector.load %arg3[%c0_1, %c0_2] : memref<128x128xbf16, #tpu.memory_space<vmem>>, vector<128x128xbf16>
    %cst = arith.constant dense<0.000000e+00> : vector<16x128xf32>
    %3 = tpu.matmul %1, %2, %cst {dimension_numbers = #tpu.dot_dimension_numbers<[1], [0], [0], [1], [0, 0, 1, 1], [], []>} : vector<16x128xbf16>, vector<128x128xbf16>, vector<16x128xf32> -> vector<16x128xf32>
    %c0_3 = arith.constant 0 : index
    %c0_4 = arith.constant 0 : index
    %4 = vector.load %arg2[%c0_3, %c0_4] : memref<16x128xf32, #tpu.memory_space<vmem>>, vector<16x128xf32>
    %5 = arith.truncf %4 : vector<16x128xf32> to vector<16x128xbf16>
    %c0_5 = arith.constant 0 : index
    %c0_6 = arith.constant 0 : index
    %6 = vector.load %arg4[%c0_5, %c0_6] : memref<128x128xbf16, #tpu.memory_space<vmem>>, vector<128x128xbf16>
    %cst_7 = arith.constant dense<0.000000e+00> : vector<16x128xf32>
    %7 = tpu.matmul %5, %6, %cst_7 {dimension_numbers = #tpu.dot_dimension_numbers<[1], [0], [0], [1], [0, 0, 1, 1], [], []>} : vector<16x128xbf16>, vector<128x128xbf16>, vector<16x128xf32> -> vector<16x128xf32>
    %8 = arith.addf %3, %7 : vector<16x128xf32>
    %c0_8 = arith.constant 0 : index
    %c0_9 = arith.constant 0 : index
    %9 = vector.load %arg5[%c0_8, %c0_9] : memref<1x128xf32, #tpu.memory_space<vmem>>, vector<1x128xf32>
    %10 = vector.broadcast %9 : vector<1x128xf32> to vector<16x128xf32>
    %11 = arith.addf %8, %10 : vector<16x128xf32>
    %c0_10 = arith.constant 0 : index
    %c0_11 = arith.constant 0 : index
    %12 = vector.load %arg6[%c0_10, %c0_11] : memref<1x128xf32, #tpu.memory_space<vmem>>, vector<1x128xf32>
    %c0_12 = arith.constant 0 : index
    %c0_13 = arith.constant 0 : index
    %13 = vector.load %arg7[%c0_12, %c0_13] : memref<1x128xf32, #tpu.memory_space<vmem>>, vector<1x128xf32>
    %cst_14 = arith.constant dense<0.000000e+00> : vector<16xf32>
    %14 = vector.multi_reduction <add>, %11, %cst_14 [1] : vector<16x128xf32> to vector<16xf32>
    %15 = vector.shape_cast %14 : vector<16xf32> to vector<16x1xf32>
    %cst_15 = arith.constant 3.125000e-02 : f32
    %16 = vector.broadcast %cst_15 : f32 to vector<16x1xf32>
    %17 = arith.mulf %15, %16 : vector<16x1xf32>
    %18 = vector.broadcast %17 : vector<16x1xf32> to vector<16x128xf32>
    %19 = arith.subf %11, %18 : vector<16x128xf32>
    %20 = tpu.iota {dimensions = array<i32: 1>} : vector<1x128xi32>
    %c32_i32 = arith.constant 32 : i32
    %21 = vector.broadcast %c32_i32 : i32 to vector<1x128xi32>
    %22 = arith.cmpi slt, %20, %21 : vector<1x128xi32>
    %23 = arith.extui %22 : vector<1x128xi1> to vector<1x128xi32>
    %24 = arith.sitofp %23 : vector<1x128xi32> to vector<1x128xf32>
    %25 = vector.broadcast %24 : vector<1x128xf32> to vector<16x128xf32>
    %26 = arith.mulf %19, %25 : vector<16x128xf32>
    %27 = arith.mulf %26, %26 : vector<16x128xf32>
    %cst_16 = arith.constant dense<0.000000e+00> : vector<16xf32>
    %28 = vector.multi_reduction <add>, %27, %cst_16 [1] : vector<16x128xf32> to vector<16xf32>
    %29 = vector.shape_cast %28 : vector<16xf32> to vector<16x1xf32>
    %cst_17 = arith.constant 3.125000e-02 : f32
    %30 = vector.broadcast %cst_17 : f32 to vector<16x1xf32>
    %31 = arith.mulf %29, %30 : vector<16x1xf32>
    %cst_18 = arith.constant 9.99999974E-6 : f32
    %32 = vector.broadcast %cst_18 : f32 to vector<16x1xf32>
    %33 = arith.addf %31, %32 : vector<16x1xf32>
    %34 = math.rsqrt %33 : vector<16x1xf32>
    %35 = vector.broadcast %34 : vector<16x1xf32> to vector<16x128xf32>
    %36 = arith.mulf %26, %35 : vector<16x128xf32>
    %37 = vector.broadcast %12 : vector<1x128xf32> to vector<16x128xf32>
    %38 = arith.mulf %36, %37 : vector<16x128xf32>
    %39 = vector.broadcast %13 : vector<1x128xf32> to vector<16x128xf32>
    %40 = arith.addf %38, %39 : vector<16x128xf32>
    %41 = arith.addf %0, %40 : vector<16x128xf32>
    %c0_19 = arith.constant 0 : index
    %c0_20 = arith.constant 0 : index
    %42 = vector.load %arg8[%c0_19, %c0_20] : memref<16x128xf32, #tpu.memory_space<vmem>>, vector<16x128xf32>
    tpu.vector_store %arg8[%c0_19, %c0_20], %41 {strides = array<i32>} : memref<16x128xf32, #tpu.memory_space<vmem>>, vector<16x128xf32>,
    return
  }
  func.func @transform_0(%arg0: i32) -> (i32, i32) {
    %c0_i32 = arith.constant 0 : i32
    %c0_i32_0 = arith.constant 0 : i32
    return %arg0, %c0_i32 : i32, i32
  }
  func.func @transform_1(%arg0: i32) -> (i32, i32) {
    %c0_i32 = arith.constant 0 : i32
    %c0_i32_0 = arith.constant 0 : i32
    return %arg0, %c0_i32 : i32, i32
  }
  func.func @transform_2(%arg0: i32) -> (i32, i32) {
    %c0_i32 = arith.constant 0 : i32
    %c0_i32_0 = arith.constant 0 : i32
    %c0_i32_1 = arith.constant 0 : i32
    return %c0_i32, %c0_i32_0 : i32, i32
  }
  func.func @transform_3(%arg0: i32) -> (i32, i32) {
    %c0_i32 = arith.constant 0 : i32
    %c0_i32_0 = arith.constant 0 : i32
    %c0_i32_1 = arith.constant 0 : i32
    return %c0_i32, %c0_i32_0 : i32, i32
  }
  func.func @transform_4(%arg0: i32) -> (i32, i32) {
    %c0_i32 = arith.constant 0 : i32
    %c0_i32_0 = arith.constant 0 : i32
    %c0_i32_1 = arith.constant 0 : i32
    return %c0_i32, %c0_i32_0 : i32, i32
  }
  func.func @transform_5(%arg0: i32) -> (i32, i32) {
    %c0_i32 = arith.constant 0 : i32
    %c0_i32_0 = arith.constant 0 : i32
    %c0_i32_1 = arith.constant 0 : i32
    return %c0_i32, %c0_i32_0 : i32, i32
  }
  func.func @transform_6(%arg0: i32) -> (i32, i32) {
    %c0_i32 = arith.constant 0 : i32
    %c0_i32_0 = arith.constant 0 : i32
    %c0_i32_1 = arith.constant 0 : i32
    return %c0_i32, %c0_i32_0 : i32, i32
  }
  func.func @transform_7(%arg0: i32) -> (i32, i32) {
    %c0_i32 = arith.constant 0 : i32
    %c0_i32_0 = arith.constant 0 : i32
    return %arg0, %c0_i32 : i32, i32
  }
}

</mosaic_0001>

<bundles_post_ra>
// kernel: erwin_embedding_forward.7
= control target key start
LH: loop header
LB: loop body
LE: loop exit
PB: predicated region body
PF: predicated region fallthrough
CT: control target
= control target key end

     0   :  { %vm30_vm0 = vcmask 1043456   ;;  %v93_v0 = vmov 0.0   ;;  %vm94_vm1 = vmmov 0   ;;  %vm26_vm2 = vcmask 64512   ;;  %s133_s1 = inlined_call_operand.vmem [shape: bf16[8,128], index: 1, kind: input, shape index: {}]   ;;  %s134_s0 = inlined_call_operand.vmem [shape: f32[16,8], index: 0, kind: input, shape index: {}]   ;;  %s135_s2 = inlined_call_operand.vmem [shape: f32[1,128], index: 2, kind: input, shape index: {}]   ;;  %s136_s3 = inlined_call_operand.vmem [shape: f32[16,128], index: 3, kind: output, shape index: {}]  }
   0x1   :  { %85 = vmatprep.subr.bf16.mxu0 %v93_v0  ;;  %v18_v1 = vld [vmem:[%s133_s1] sm:$0xf]  ;;  %87 = vmatprep.mubr.msk.bf16.mxu0 %vm94_vm1, %v93_v0  ;;  %v16_v3 = vld [vmem:[%s134_s0 + $0x8] sm:$0xff] }
   0x2   :  { %v15_v2 = vld [vmem:[%s134_s0] sm:$0xff]  ;;  %v32_v4 = vsel %vm30_vm0, %v18_v1, 0 }
   0x3   :  { %v17_v5 = vpack.c.bf16 %v16_v3, %v15_v2  ;;  %86 = vmatpush3.bf16.msra.mxu0 %v32_v4  ;;  %v81_v6 = vld [vmem:[%s135_s2] ss:$0 sm:$0xff] }
   0x6   :  { %88 = vmatmul.mubr.msk.bf16.vlgmr.msra.gmra.mxu0 %vm26_vm2, %v17_v5 }
  0xc6   :  { %v68_v7 = vpop.f32.mrf.mxu0 }
  0xc7   :  { %v69_v8 = vadd.f32 %v81_v6, %v68_v7 }
  0xc8   :  { %v89_v9 = vpop.f32.mrf.mxu0 }
  0xc9   :  { %75 = vst [vmem:[%s136_s3] sm:$0xff] %v69_v8 }
  0xca   :  { %v71_v10 = vpop.f32.mrf.mxu0 }
  0xcb   :  { %v72_v11 = vadd.f32 %v81_v6, %v71_v10 }
  0xcc   :  { %v90_v12 = vpop.f32.mrf.mxu0 }
  0xcd   :  { %76 = vst [vmem:[%s136_s3 + $0x8] sm:$0xff] %v72_v11 }

// kernel: erwin_embedding_forward.8
= control target key start
LH: loop header
LB: loop body
LE: loop exit
PB: predicated region body
PF: predicated region fallthrough
CT: control target
= control target key end

     0   :  { %vm37_vm0 = vcmask 1040384   ;;  %vm38_vm1 = vcmask 1041408   ;;  %v455_v0 = vmov 0.0   ;;  %v456_v2 = vmov 65535   ;;  %s593_s2 = inlined_call_operand.vmem [shape: bf16[128,128], index: 2, kind: input, shape index: {}]   ;;  %s594_s4 = inlined_call_operand.vmem [shape: bf16[3,128], index: 4, kind: input, shape index: {}]   ;;  %s595_s1 = inlined_call_operand.vmem [shape: f32[16,3], index: 1, kind: input, shape index: {}]   ;;  %s596_s3 = inlined_call_operand.vmem [shape: bf16[128,128], index: 3, kind: input, shape index: {}]   ;;  %s597_s0 = inlined_call_operand.vmem [shape: f32[16,128], index: 0, kind: input, shape index: {}]   ;;  %s598_s5 = inlined_call_operand.vmem [shape: f32[1,128], index: 5, kind: input, shape index: {}]   ;;  %s599_s6 = inlined_call_operand.vmem [shape: bf16[16,128], index: 6, kind: output, shape index: {0}]   ;;  %s600_s7 = inlined_call_operand.vmem [shape: bf16[16,128], index: 7, kind: output, shape index: {1}]  }
   0x1   :  { %396 = vmatprep.subr.bf16.mxu1 %v455_v0  ;;  %390 = vmatprep.subr.bf16.mxu0 %v455_v0  ;;  %v439_v1 = vld [vmem:[%s593_s2 + $0x38] sm:$0xff]   ;;  %v39_v3 = vsel %vm37_vm0, 4294967295, %v456_v2  ;;  %v32_v4 = vld [vmem:[%s594_s4] sm:$0x3]  ;;  %v30_v7 = vld [vmem:[%s595_s1 + $0x8] sm:$0xff]  ;;  %vm457_vm2 = vmmov 0  }
   0x2   :  { %v40_v5 = vsel %vm38_vm1, %v39_v3, 0  ;;  %v29_v6 = vld [vmem:[%s595_s1] sm:$0xff]  ;;  %397 = vmatpush3.bf16.msra.mxu1 %v439_v1  ;;  %392 = vmatprep.mubr.msk.bf16.mxu0 %vm457_vm2, %v455_v0  ;;  %v440_v9 = vld [vmem:[%s593_s2 + $0x30] sm:$0xff]   ;;  %vm33_vm3 = vcmask 23552   ;;  %v441_v11 = vld [vmem:[%s596_s3 + $0x38] sm:$0xff]  }
   0x3   :  { %v42_v8 = vand.u32 %v40_v5, %v32_v4  ;;  %398 = vmatprep.subr.bf16.mxu1 %v455_v0  ;;  %v31_v10 = vpack.c.bf16 %v30_v7, %v29_v6  ;;  %412 = vmatprep.mubr.msk.bf16.mxu1 %vm457_vm2, %v455_v0  ;;  %v442_v12 = vld [vmem:[%s593_s2 + $0x28] sm:$0xff]   ;;  %v443_v13 = vld [vmem:[%s596_s3 + $0x30] sm:$0xff]   ;;  %v444_v14 = vld [vmem:[%s593_s2 + $0x20] sm:$0xff]  }
   0x4   :  { %v445_v15 = vld [vmem:[%s596_s3 + $0x28] sm:$0xff]   ;;  %v446_v16 = vld [vmem:[%s593_s2 + $0x18] sm:$0xff]   ;;  %v447_v17 = vld [vmem:[%s596_s3 + $0x20] sm:$0xff]  }
   0x5   :  { %391 = vmatpush3.bf16.msra.mxu0 %v42_v8  ;;  %v448_v18 = vld [vmem:[%s593_s2 + $0x10] sm:$0xff]   ;;  %v449_v19 = vld [vmem:[%s596_s3 + $0x18] sm:$0xff]   ;;  %v450_v20 = vld [vmem:[%s593_s2 + $0x8] sm:$0xff]  }
   0x6   :  { %416 = vmatprep.subr.bf16.mxu0 %v455_v0  ;;  %399 = vmatpush3.bf16.msra.mxu1 %v440_v9  ;;  %v451_v21 = vld [vmem:[%s596_s3 + $0x10] sm:$0xff]   ;;  %v452_v22 = vld [vmem:[%s593_s2] sm:$0xff]   ;;  %v27_v24 = vld [vmem:[%s597_s0 + $0x8] sm:$0xff] }
   0x7   :  { %400 = vmatprep.subr.bf16.mxu1 %v455_v0  ;;  %v26_v23 = vld [vmem:[%s597_s0] sm:$0xff]  ;;  %v453_v25 = vld [vmem:[%s596_s3 + $0x8] sm:$0xff]  }
   0x8   :  { %393 = vmatmul.mubr.msk.bf16.vlgmr.msra.gmra.mxu0 %vm33_vm3, %v31_v10  ;;  %v28_v26 = vpack.c.bf16 %v27_v24, %v26_v23  ;;  %v454_v27 = vld [vmem:[%s596_s3] sm:$0xff]  }
   0x9   :  { %417 = vmatpush3.bf16.msra.mxu0 %v441_v11  ;;  %432 = vmatprep.mubr.msk.bf16.mxu0 %vm457_vm2, %v455_v0  ;;  %v343_v35 = vld [vmem:[%s598_s5] ss:$0 sm:$0xff] }
   0xa   :  { %418 = vmatprep.subr.bf16.mxu0 %v455_v0  ;;  %401 = vmatpush3.bf16.msra.mxu1 %v442_v12 }
   0xb   :  { %402 = vmatprep.subr.bf16.mxu1 %v455_v0 }
   0xd   :  { %419 = vmatpush3.bf16.msra.mxu0 %v443_v13 }
   0xe   :  { %420 = vmatprep.subr.bf16.mxu0 %v455_v0  ;;  %403 = vmatpush3.bf16.msra.mxu1 %v444_v14 }
   0xf   :  { %404 = vmatprep.subr.bf16.mxu1 %v455_v0 }
  0x11   :  { %421 = vmatpush3.bf16.msra.mxu0 %v445_v15 }
  0x12   :  { %422 = vmatprep.subr.bf16.mxu0 %v455_v0  ;;  %405 = vmatpush3.bf16.msra.mxu1 %v446_v16 }
  0x13   :  { %406 = vmatprep.subr.bf16.mxu1 %v455_v0 }
  0x15   :  { %423 = vmatpush3.bf16.msra.mxu0 %v447_v17 }
  0x16   :  { %424 = vmatprep.subr.bf16.mxu0 %v455_v0  ;;  %407 = vmatpush3.bf16.msra.mxu1 %v448_v18 }
  0x17   :  { %408 = vmatprep.subr.bf16.mxu1 %v455_v0 }
  0x19   :  { %425 = vmatpush3.bf16.msra.mxu0 %v449_v19 }
  0x1a   :  { %426 = vmatprep.subr.bf16.mxu0 %v455_v0  ;;  %409 = vmatpush3.bf16.msra.mxu1 %v450_v20 }
  0x1b   :  { %410 = vmatprep.subr.bf16.mxu1 %v455_v0 }
  0x1d   :  { %427 = vmatpush3.bf16.msra.mxu0 %v451_v21 }
  0x1e   :  { %428 = vmatprep.subr.bf16.mxu0 %v455_v0  ;;  %411 = vmatpush3.bf16.msra.mxu1 %v452_v22 }
  0x21   :  { %429 = vmatpush3.bf16.msra.mxu0 %v453_v25  ;;  %413 = vmatmul.mubr.bf16.vlgmr.msra.gmra.mxu1 %v28_v26 }
  0x22   :  { %430 = vmatprep.subr.bf16.mxu0 %v455_v0 }
  0x25   :  { %431 = vmatpush3.bf16.msra.mxu0 %v454_v27 }
  0x28   :  { %433 = vmatmul.mubr.bf16.vlgmr.msra.gmra.mxu0 %v28_v26 }
  0xc8   :  { %v78_v28 = vpop.f32.mrf.mxu0 }
  0xca   :  { %v394_v29 = vpop.f32.mrf.mxu0 }
  0xcc   :  { %v81_v30 = vpop.f32.mrf.mxu0 }
  0xce   :  { %v395_v31 = vpop.f32.mrf.mxu0 }
  0xe1   :  { %v183_v32 = vpop.f32.mrf.mxu1 }
  0xe2   :  { %v184_v34 = vadd.f32 %v183_v32, %v78_v28 }
  0xe3   :  { %v414_v33 = vpop.f32.mrf.mxu1 }
  0xe4   :  { %v197_v40 = vadd.f32 %v343_v35, %v184_v34 }
  0xe5   :  { %v186_v36 = vpop.f32.mrf.mxu1 }
  0xe6   :  { %v187_v37 = vadd.f32 %v186_v36, %v81_v30 }
  0xe7   :  { %v415_v39 = vpop.f32.mrf.mxu1 }
  0xe8   :  { %v297_v38 = vpop.f32.mrf.mxu0  ;;  %v198_v41 = vadd.f32 %v343_v35, %v187_v37 }
  0xe9   :  { %v304_v45 = vsub.f32 %v297_v38, %v78_v28 }
  0xea   :  { %v434_v42 = vpop.f32.mrf.mxu0  ;;  %v363_v43 = vpack.c.bf16 %v198_v41, %v197_v40 }
  0xec   :  { %v300_v44 = vpop.f32.mrf.mxu0  ;;  %364 = vst [vmem:[%s599_s6] sm:$0xff] %v363_v43  }
  0xed   :  { %v305_v46 = vsub.f32 %v300_v44, %v81_v30 }
  0xee   :  { %v435_v47 = vpop.f32.mrf.mxu0 }
  0xef   :  { %v368_v48 = vpack.c.bf16 %v305_v46, %v304_v45 }
  0xf1   :  { %369 = vst [vmem:[%s600_s7] sm:$0xff] %v368_v48  }

// kernel: erwin_embedding_forward.9
= control target key start
LH: loop header
LB: loop body
LE: loop exit
PB: predicated region body
PF: predicated region fallthrough
CT: control target
= control target key end

     0   :  { %v30_v0 = vlaneseq  ;;  %v926_v5 = vmov 0.0   ;;  %vm90_vm5 = vcmask 130048   ;;  %vm927_vm7 = vmmov 0   ;;  %s1267_s3 = inlined_call_operand.vmem [shape: s32[1,1,128], index: 3, kind: input, shape index: {}]   ;;  %s1268_s1 = inlined_call_operand.vmem [shape: bf16[16,128], index: 1, kind: input, shape index: {}]   ;;  %s1269_s0 = inlined_call_operand.vmem [shape: bf16[16,128], index: 0, kind: input, shape index: {}]   ;;  %s1270_s2 = inlined_call_operand.vmem [shape: s32[1,1,128], index: 2, kind: input, shape index: {}]   ;;  %s1271_s5 = inlined_call_operand.vmem [shape: f32[1,128], index: 5, kind: input, shape index: {}]   ;;  %s1272_s6 = inlined_call_operand.vmem [shape: f32[1,128], index: 6, kind: input, shape index: {}]   ;;  %s1273_s4 = inlined_call_operand.vmem [shape: f32[1,1,128], index: 4, kind: input, shape index: {}]   ;;  %s1274_s7 = inlined_call_operand.vmem [shape: f32[16,128], index: 7, kind: output, shape index: {}]  }
   0x1   :  { %v746_v1 = vld [vmem:[%s1267_s3] ss:$0 sm:$0xff] }
   0x2   :  { %v31_v2 = vshrl.u32 %v30_v0, 7  ;;  %v860_v3 = vld [vmem:[%s1268_s1] sm:$0xff]  }
   0x3   :  { %801 = vmatprep.subr.bf16.mxu0 %v860_v3  ;;  %v861_v10 = vld [vmem:[%s1269_s0] sm:$0xff]  }
   0x4   :  { %v32_v4 = vadd.s32 8, %v31_v2  ;;  %vm48_vm0 = vcmp.eq.s32.totalorder %v31_v2, %v746_v1  ;;  %802 = vmatpush3.bf16.msra.mxu0 %v860_v3  ;;  %819 = vmatprep.subr.bf16.mxu1 %v861_v10  ;;  %v743_v11 = vld [vmem:[%s1270_s2] ss:$0 sm:$0xff] }
   0x5   :  { %v747_v6 = vsel %vm48_vm0, 1.0, %v926_v5  ;;  %837 = vmatprep.subr.bf16.mxu0 %v926_v5  ;;  %820 = vmatpush3.bf16.msra.mxu1 %v861_v10  ;;  %vm37_vm3 = vcmp.eq.s32.totalorder %v31_v2, %v743_v11 }
   0x6   :  { %vm49_vm1 = vcmp.eq.s32.totalorder %v32_v4, %v746_v1  ;;  %vm38_vm4 = vcmp.eq.s32.totalorder %v32_v4, %v743_v11  ;;  %v744_v12 = vsel %vm37_vm3, 1.0, %v926_v5 }
   0x7   :  { %v748_v7 = vsel %vm49_vm1, 1.0, %v926_v5  ;;  %vm978_vm2 = vmpackc.low %vm49_vm1, %vm48_vm0  ;;  %v745_v13 = vsel %vm38_vm4, 1.0, %v926_v5 }
   0x8   :  { %v54_v9 = vpack.c.bf16 %v748_v7, %v747_v6  ;;  %v43_v14 = vpack.c.bf16 %v745_v13, %v744_v12 }
   0xa   :  { %68 = vxpose.xlu0.c.b16.start.end [1/1] (short) %v54_v9, 128 }
  0x27   :  { %212 = vxpose.xlu0.c.b16.start.end [1/1] (short) %v43_v14, 128 }
  0x6c   :  { %v76_v15 = vpop.trf.xlu0 }
  0x6d   :  { %803 = vmatprep.mubr.msk.bf16.mxu0 %vm90_vm5, %v76_v15 }
  0x70   :  { %v77_v16 = vpop.trf.xlu0 }
  0x71   :  { %804 = vmatmul.mubr.msk.bf16.vlgmr.msra.gmra.mxu0 %vm90_vm5, %v77_v16 }
  0x74   :  { %v78_v17 = vpop.trf.xlu0 }
  0x75   :  { %807 = vmatprep.mubr.msk.bf16.mxu0 %vm90_vm5, %v78_v17 }
  0x78   :  { %v79_v18 = vpop.trf.xlu0 }
  0x79   :  { %808 = vmatmul.mubr.msk.bf16.gmra.mxu0 %vm90_vm5, %v79_v18 }
  0x7c   :  { %v80_v19 = vpop.trf.xlu0 }
  0x7d   :  { %811 = vmatprep.mubr.msk.bf16.mxu0 %vm90_vm5, %v80_v19 }
  0x80   :  { %v81_v20 = vpop.trf.xlu0 }
  0x81   :  { %812 = vmatmul.mubr.msk.bf16.gmra.mxu0 %vm90_vm5, %v81_v20 }
  0x84   :  { %v82_v21 = vpop.trf.xlu0 }
  0x85   :  { %815 = vmatprep.mubr.msk.bf16.mxu0 %vm90_vm5, %v82_v21 }
  0x88   :  { %v83_v22 = vpop.trf.xlu0 }
  0x89   :  { %816 = vmatmul.mubr.msk.bf16.gmra.mxu0 %vm90_vm5, %v83_v22 }
  0x8a   :  { %853 = vmatprep.mubr.msk.bf16.mxu0 %vm927_vm7, %v926_v5 }
  0x8c   :  { %v220_v23 = vpop.trf.xlu0 }
  0x8d   :  { %821 = vmatprep.mubr.msk.bf16.mxu1 %vm90_vm5, %v220_v23 }
  0x90   :  { %v221_v24 = vpop.trf.xlu0 }
  0x91   :  { %822 = vmatmul.mubr.msk.bf16.vlgmr.msra.gmra.mxu1 %vm90_vm5, %v221_v24 }
  0x94   :  { %v222_v25 = vpop.trf.xlu0 }
  0x95   :  { %825 = vmatprep.mubr.msk.bf16.mxu1 %vm90_vm5, %v222_v25 }
  0x98   :  { %v223_v26 = vpop.trf.xlu0 }
  0x99   :  { %826 = vmatmul.mubr.msk.bf16.gmra.mxu1 %vm90_vm5, %v223_v26 }
  0x9c   :  { %v224_v27 = vpop.trf.xlu0 }
  0x9d   :  { %829 = vmatprep.mubr.msk.bf16.mxu1 %vm90_vm5, %v224_v27 }
  0xa0   :  { %v225_v28 = vpop.trf.xlu0 }
  0xa1   :  { %830 = vmatmul.mubr.msk.bf16.gmra.mxu1 %vm90_vm5, %v225_v28 }
  0xa4   :  { %v226_v29 = vpop.trf.xlu0 }
  0xa5   :  { %833 = vmatprep.mubr.msk.bf16.mxu1 %vm90_vm5, %v226_v29 }
  0xa8   :  { %v227_v30 = vpop.trf.xlu0 }
  0xa9   :  { %834 = vmatmul.mubr.msk.bf16.gmra.mxu1 %vm90_vm5, %v227_v30 }
 0x131   :  { %v1006_v31 = vpop.f32.mrf.mxu0 }
 0x133   :  { %v1008_v32 = vpop.f32.mrf.mxu0 }
 0x135   :  { %v1010_v33 = vpop.f32.mrf.mxu0 }
 0x137   :  { %v1012_v34 = vpop.f32.mrf.mxu0 }
 0x139   :  { %v809_v35 = vpop.f32.mrf.mxu0 }
 0x13b   :  { %v1014_v36 = vpop.f32.mrf.mxu0 }
 0x13d   :  { %v810_v37 = vpop.f32.mrf.mxu0 }
 0x13f   :  { %v1020_v40 = vpop.f32.mrf.mxu0 }
 0x141   :  { %v813_v43 = vpop.f32.mrf.mxu0 }
 0x143   :  { %v181_v47 = vpop.f32.mrf.mxu0 }
 0x145   :  { %v814_v52 = vpop.f32.mrf.mxu0 }
 0x147   :  { %v184_v57 = vpop.f32.mrf.mxu0 }
 0x149   :  { %v817_v1 = vpop.f32.mrf.mxu0 }
 0x14b   :  { %v197_v11 = vpop.f32.mrf.mxu0 }
 0x14d   :  { %v818_v19 = vpop.f32.mrf.mxu0 }
 0x14f   :  { %v200_v30 = vpop.f32.mrf.mxu0 }
 0x151   :  { %v1016_v38 = vpop.f32.mrf.mxu1 }
 0x153   :  { %v1018_v39 = vpop.f32.mrf.mxu1 }
 0x155   :  { %v1022_v41 = vpop.f32.mrf.mxu1 }
 0x157   :  { %v1024_v42 = vpop.f32.mrf.mxu1 }
 0x159   :  { %v827_v44 = vpop.f32.mrf.mxu1 }
 0x15a   :  { %v317_v45 = vadd.f32 %v827_v44, %v809_v35 }
 0x15b   :  { %v1026_v46 = vpop.f32.mrf.mxu1 }
 0x15c   :  { %v377_v48 = vmul.f32 0.70710677, %v317_v45  ;;  %v361_v12 = vmul.f32 0.5, %v317_v45 }
 0x15d   :  { %v828_v49 = vpop.f32.mrf.mxu1 }
 0x15e   :  { %862 = verf.f32 %v377_v48  ;;  %v320_v50 = vadd.f32 %v828_v49, %v810_v37  ;;  %v309_v48 = vadd.f32 %v1026_v46, %v1014_v36  ;;  %v301_v36 = vadd.f32 %v1016_v38, %v1006_v31 }
 0x15f   :  { %v1028_v51 = vpop.f32.mrf.mxu1  ;;  %v293_v31 = vadd.f32 %v1018_v39, %v1008_v32 }
 0x160   :  { %v378_v53 = vmul.f32 0.70710677, %v320_v50  ;;  %v362_v20 = vmul.f32 0.5, %v320_v50 }
 0x161   :  { %v831_v54 = vpop.f32.mrf.mxu1 }
 0x162   :  { %864 = verf.f32 %v378_v53  ;;  %v333_v55 = vadd.f32 %v831_v54, %v813_v43 }
 0x163   :  { %v324_v56 = vpop.f32.mrf.mxu1 }
 0x164   :  { %v381_v58 = vmul.f32 0.70710677, %v333_v55  ;;  %v325_v59 = vadd.f32 %v324_v56, %v181_v47  ;;  %v365_v27 = vmul.f32 0.5, %v333_v55  ;;  %v375_v55 = vmul.f32 0.70710677, %v309_v48 }
 0x165   :  { %v832_v60 = vpop.f32.mrf.mxu1  ;;  %v312_v56 = vadd.f32 %v1028_v51, %v1020_v40  ;;  %v373_v40 = vmul.f32 0.70710677, %v301_v36  ;;  %v304_v51 = vadd.f32 %v1022_v41, %v1010_v33  ;;  %v371_v33 = vmul.f32 0.70710677, %v293_v31 }
 0x166   :  { %866 = verf.f32 %v381_v58  ;;  %v379_v61 = vmul.f32 0.70710677, %v325_v59  ;;  %v336_v62 = vadd.f32 %v832_v60, %v814_v52  ;;  %v363_v47 = vmul.f32 0.5, %v325_v59 }
 0x167   :  { %v327_v63 = vpop.f32.mrf.mxu1  ;;  %v374_v38 = vmul.f32 0.70710677, %v304_v51  ;;  %v296_v41 = vadd.f32 %v1024_v42, %v1012_v34 }
 0x168   :  { %868 = verf.f32 %v379_v61  ;;  %v382_v2 = vmul.f32 0.70710677, %v336_v62  ;;  %v328_v3 = vadd.f32 %v327_v63, %v184_v57  ;;  %v366_v54 = vmul.f32 0.5, %v336_v62 }
 0x169   :  { %v835_v4 = vpop.f32.mrf.mxu1  ;;  %v376_v61 = vmul.f32 0.70710677, %v312_v56  ;;  %v372_v32 = vmul.f32 0.70710677, %v296_v41 }
 0x16a   :  { %870 = verf.f32 %v382_v2  ;;  %v380_v6 = vmul.f32 0.70710677, %v328_v3  ;;  %v349_v7 = vadd.f32 %v835_v4, %v817_v1  ;;  %v364_v60 = vmul.f32 0.5, %v328_v3 }
 0x16b   :  { %v863_v9 = vpop.eup %862  ;;  %v340_v10 = vpop.f32.mrf.mxu1 }
 0x16c   :  { %v341_v13 = vadd.f32 %v340_v10, %v197_v11  ;;  %v409_v14 = vadd.f32 1.0, %v863_v9  ;;  %872 = verf.f32 %v380_v6  ;;  %v385_v15 = vmul.f32 0.70710677, %v349_v7 }
 0x16d   :  { %v836_v17 = vpop.f32.mrf.mxu1  ;;  %v369_v1 = vmul.f32 0.5, %v349_v7 }
 0x16e   :  { %v1030_v18 = vmul.f32 %v409_v14, %v361_v12  ;;  %v383_v21 = vmul.f32 0.70710677, %v341_v13  ;;  %874 = verf.f32 %v385_v15  ;;  %v352_v23 = vadd.f32 %v836_v17, %v818_v19 }
 0x16f   :  { %v865_v16 = vpop.eup %864  ;;  %v343_v25 = vpop.f32.mrf.mxu1  ;;  %v367_v6 = vmul.f32 0.5, %v341_v13  ;;  %v359_v19 = vmul.f32 0.5, %v309_v48 }
 0x170   :  { %449 = vadd.xlane.f32.xlu1 %v1030_v18  ;;  %v410_v22 = vadd.f32 1.0, %v865_v16  ;;  %876 = verf.f32 %v383_v21  ;;  %v386_v35 = vmul.f32 0.70710677, %v352_v23  ;;  %v344_v37 = vadd.f32 %v343_v25, %v200_v30 }
 0x171   :  { %v370_v11 = vmul.f32 0.5, %v352_v23  ;;  %v360_v21 = vmul.f32 0.5, %v312_v56  ;;  %v357_v25 = vmul.f32 0.5, %v301_v36  ;;  %v358_v30 = vmul.f32 0.5, %v304_v51 }
 0x172   :  { %v1033_v26 = vmul.f32 %v410_v22, %v362_v20  ;;  %878 = verf.f32 %v386_v35  ;;  %v384_v49 = vmul.f32 0.70710677, %v344_v37  ;;  %v368_v15 = vmul.f32 0.5, %v344_v37 }
 0x173   :  { %v867_v24 = vpop.eup %866 }
 0x174   :  { %v413_v28 = vadd.f32 1.0, %v867_v24  ;;  %451 = vadd.xlane.f32.xlu0 %v1033_v26  ;;  %880 = verf.f32 %v384_v49  ;;  %v356_v49 = vmul.f32 0.5, %v296_v41 }
 0x175   :  { %v869_v29 = vpop.eup %868  ;;  %882 = verf.f32 %v375_v55 }
 0x176   :  { %v1036_v43 = vmul.f32 %v413_v28, %v365_v27  ;;  %v411_v44 = vadd.f32 1.0, %v869_v29  ;;  %884 = verf.f32 %v376_v61 }
 0x177   :  { %v871_v45 = vpop.eup %870  ;;  %886 = verf.f32 %v373_v40 }
 0x178   :  { %457 = vadd.xlane.f32.xlu1 %v1036_v43  ;;  %v1041_v50 = vmul.f32 %v411_v44, %v363_v47  ;;  %v414_v52 = vadd.f32 1.0, %v871_v45  ;;  %888 = verf.f32 %v374_v38  ;;  %v355_v45 = vmul.f32 0.5, %v293_v31 }
 0x179   :  { %v873_v53 = vpop.eup %872  ;;  %890 = verf.f32 %v371_v33 }
 0x17a   :  { %v1046_v57 = vmul.f32 %v414_v52, %v366_v54  ;;  %v412_v58 = vadd.f32 1.0, %v873_v53  ;;  %892 = verf.f32 %v372_v32  ;;  %v502_v54 = vand.u32 127, %v30_v0 }
 0x17b   :  { %v875_v59 = vpop.eup %874 }
 0x17c   :  { %453 = vadd.xlane.f32.xlu1 %v1041_v50  ;;  %v1051_v62 = vmul.f32 %v412_v58, %v364_v60  ;;  %v417_v63 = vadd.f32 1.0, %v875_v59  ;;  %vm503_vm6 = vcmp.lt.s32.totalorder %v502_v54, 32 }
 0x17d   :  { %v877_v46 = vpop.eup %876  ;;  %v1093_v60 = vsel %vm503_vm6, 1.0, %v926_v5 }
 0x17e   :  { %v1056_v2 = vmul.f32 %v417_v63, %v369_v1  ;;  %v415_v3 = vadd.f32 1.0, %v877_v46 }
 0x17f   :  { %v879_v4 = vpop.eup %878 }
 0x180   :  { %459 = vadd.xlane.f32.xlu1 %v1046_v57  ;;  %v1061_v7 = vmul.f32 %v415_v3, %v367_v6  ;;  %v418_v9 = vadd.f32 1.0, %v879_v4 }
 0x181   :  { %v881_v10 = vpop.eup %880 }
 0x182   :  { %v1066_v12 = vmul.f32 %v418_v9, %v370_v11  ;;  %v416_v13 = vadd.f32 1.0, %v881_v10  ;;  %v883_v14 = vpop.eup %882 }
 0x183   :  { %v407_v16 = vadd.f32 1.0, %v883_v14  ;;  %v885_v17 = vpop.eup %884 }
 0x184   :  { %455 = vadd.xlane.f32.xlu1 %v1051_v62  ;;  %v1069_v39 = vmul.f32 %v416_v13, %v368_v15  ;;  %v408_v34 = vadd.f32 1.0, %v885_v17  ;;  %v887_v42 = vpop.eup %886 }
 0x185   :  { %v1072_v20 = vmul.f32 %v407_v16, %v359_v19  ;;  %v405_v23 = vadd.f32 1.0, %v887_v42  ;;  %v889_v24 = vpop.eup %888 }
 0x186   :  { %v1075_v22 = vmul.f32 %v408_v34, %v360_v21  ;;  %v406_v28 = vadd.f32 1.0, %v889_v24  ;;  %v891_v29 = vpop.eup %890 }
 0x187   :  { %v1078_v27 = vmul.f32 %v405_v23, %v357_v25  ;;  %v403_v37 = vadd.f32 1.0, %v891_v29  ;;  %v893_v44 = vpop.eup %892 }
 0x188   :  { %465 = vadd.xlane.f32.xlu1 %v1056_v2  ;;  %v1081_v35 = vmul.f32 %v406_v28, %v358_v30  ;;  %v404_v48 = vadd.f32 1.0, %v893_v44 }
 0x189   :  { %v1084_v47 = vmul.f32 %v403_v37, %v355_v45 }
 0x18a   :  { %v1087_v52 = vmul.f32 %v404_v48, %v356_v49 }
 0x18c   :  { %461 = vadd.xlane.f32.xlu1 %v1061_v7 }
 0x190   :  { %467 = vadd.xlane.f32.xlu1 %v1066_v12 }
 0x194   :  { %463 = vadd.xlane.f32.xlu1 %v1069_v39 }
 0x198   :  { %445 = vadd.xlane.f32.xlu1 %v1072_v20 }
 0x19c   :  { %447 = vadd.xlane.f32.xlu1 %v1075_v22 }
 0x1a0   :  { %441 = vadd.xlane.f32.xlu1 %v1078_v27 }
 0x1a4   :  { %443 = vadd.xlane.f32.xlu1 %v1081_v35 }
 0x1a8   :  { %437 = vadd.xlane.f32.xlu1 %v1084_v47 }
 0x1ac   :  { %439 = vadd.xlane.f32.xlu1 %v1087_v52 }
 0x1f9   :  { %v450_v53 = vpop.xlane.xlu1 %449 }
 0x1fa   :  { %v475_v58 = vmul.f32 0.03125, %v450_v53 }
 0x1fc   :  { %v491_v63 = vsub.f32 %v1030_v18, %v475_v58 }
 0x1fd   :  { %v452_v19 = vpop.xlane.xlu0 %451 }
 0x1fe   :  { %v1108_v3 = vmul.f32 %v1093_v60, %v491_v63  ;;  %v476_v28 = vmul.f32 0.03125, %v452_v19 }
 0x200   :  { %v528_v18 = vmul.f32 %v1108_v3, %v1108_v3  ;;  %v492_v45 = vsub.f32 %v1033_v26, %v476_v28 }
 0x201   :  { %v458_v55 = vpop.xlane.xlu1 %457 }
 0x202   :  { %v479_v56 = vmul.f32 0.03125, %v458_v55  ;;  %v1158_v58 = vmul.f32 %v1093_v60, %v492_v45 }
 0x204   :  { %v495_v59 = vsub.f32 %v1036_v43, %v479_v56 }
 0x205   :  { %v454_v36 = vpop.xlane.xlu1 %453 }
 0x206   :  { %v477_v46 = vmul.f32 0.03125, %v454_v36  ;;  %v1096_v61 = vmul.f32 %v1093_v60, %v495_v59 }
 0x208   :  { %v493_v1 = vsub.f32 %v1041_v50, %v477_v46  ;;  %v532_v0 = vmul.f32 %v1096_v61, %v1096_v61 }
 0x209   :  { %v460_v40 = vpop.xlane.xlu1 %459 }
 0x20a   :  { %558 = vadd.xlane.f32.xlu0 %v532_v0  ;;  %v1103_v51 = vmul.f32 %v1093_v60, %v493_v1  ;;  %v480_v15 = vmul.f32 0.03125, %v460_v40 }
 0x20c   :  { %v530_v43 = vmul.f32 %v1103_v51, %v1103_v51  ;;  %v496_v34 = vsub.f32 %v1046_v57, %v480_v15 }
 0x20d   :  { %v456_v4 = vpop.xlane.xlu1 %455 }
 0x20e   :  { %554 = vadd.xlane.f32.xlu0 %v530_v43  ;;  %v478_v42 = vmul.f32 0.03125, %v456_v4  ;;  %v1140_v37 = vmul.f32 %v1093_v60, %v496_v34 }
 0x210   :  { %v494_v29 = vsub.f32 %v1051_v62, %v478_v42  ;;  %v533_v62 = vmul.f32 %v1140_v37, %v1140_v37 }
 0x211   :  { %v466_v50 = vpop.xlane.xlu1 %465 }
 0x212   :  { %v483_v6 = vmul.f32 0.03125, %v466_v50  ;;  %550 = vadd.xlane.f32.xlu0 %v528_v18 }
 0x214   :  { %v499_v31 = vsub.f32 %v1056_v2, %v483_v6 }
 0x215   :  { %v462_v38 = vpop.xlane.xlu1 %461 }
 0x216   :  { %v481_v9 = vmul.f32 0.03125, %v462_v38  ;;  %v1114_v10 = vmul.f32 %v1093_v60, %v499_v31 }
 0x218   :  { %v497_v11 = vsub.f32 %v1061_v7, %v481_v9  ;;  %v536_v33 = vmul.f32 %v1114_v10, %v1114_v10 }
 0x219   :  { %v468_v41 = vpop.xlane.xlu1 %467 }
 0x21a   :  { %v484_v13 = vmul.f32 0.03125, %v468_v41  ;;  %566 = vadd.xlane.f32.xlu1 %v536_v33  ;;  %v1120_v14 = vmul.f32 %v1093_v60, %v497_v11 }
 0x21c   :  { %v500_v32 = vsub.f32 %v1066_v12, %v484_v13  ;;  %v534_v2 = vmul.f32 %v1120_v14, %v1120_v14 }
 0x21d   :  { %v464_v16 = vpop.xlane.xlu1 %463 }
 0x21e   :  { %v482_v17 = vmul.f32 0.03125, %v464_v16  ;;  %562 = vadd.xlane.f32.xlu1 %v534_v2  ;;  %v1126_v7 = vmul.f32 %v1093_v60, %v500_v32 }
 0x220   :  { %v498_v21 = vsub.f32 %v1069_v39, %v482_v17  ;;  %v537_v23 = vmul.f32 %v1126_v7, %v1126_v7 }
 0x221   :  { %v446_v24 = vpop.xlane.xlu1 %445 }
 0x222   :  { %v473_v12 = vmul.f32 0.03125, %v446_v24  ;;  %568 = vadd.xlane.f32.xlu1 %v537_v23  ;;  %v1133_v25 = vmul.f32 %v1093_v60, %v498_v21 }
 0x224   :  { %v489_v30 = vsub.f32 %v1072_v20, %v473_v12  ;;  %v535_v57 = vmul.f32 %v1133_v25, %v1133_v25  ;;  %v1151_v20 = vmul.f32 %v1093_v60, %v494_v29 }
 0x225   :  { %v448_v39 = vpop.xlane.xlu1 %447 }
 0x226   :  { %564 = vadd.xlane.f32.xlu1 %v535_v57  ;;  %v1143_v44 = vmul.f32 %v1093_v60, %v489_v30  ;;  %v474_v48 = vmul.f32 0.03125, %v448_v39  ;;  %v531_v26 = vmul.f32 %v1151_v20, %v1151_v20 }
 0x228   :  { %v526_v49 = vmul.f32 %v1143_v44, %v1143_v44  ;;  %v490_v55 = vsub.f32 %v1075_v22, %v474_v48  ;;  %v529_v22 = vmul.f32 %v1158_v58, %v1158_v58 }
 0x229   :  { %v442_v53 = vpop.xlane.xlu1 %441 }
 0x22a   :  { %v471_v54 = vmul.f32 0.03125, %v442_v53  ;;  %546 = vadd.xlane.f32.xlu0 %v526_v49  ;;  %560 = vadd.xlane.f32.xlu1 %v533_v62 }
 0x22c   :  { %v487_v56 = vsub.f32 %v1078_v27, %v471_v54  ;;  %v1169_v27 = vmul.f32 %v1093_v60, %v490_v55 }
 0x22d   :  { %v444_v59 = vpop.xlane.xlu1 %443 }
 0x22e   :  { %v472_v36 = vmul.f32 0.03125, %v444_v59  ;;  %556 = vadd.xlane.f32.xlu1 %v531_v26  ;;  %v1161_v46 = vmul.f32 %v1093_v60, %v487_v56  ;;  %v527_v4 = vmul.f32 %v1169_v27, %v1169_v27 }
 0x230   :  { %v488_v63 = vsub.f32 %v1081_v35, %v472_v36  ;;  %v524_v1 = vmul.f32 %v1161_v46, %v1161_v46 }
 0x231   :  { %v438_v0 = vpop.xlane.xlu1 %437 }
 0x232   :  { %v469_v40 = vmul.f32 0.03125, %v438_v0  ;;  %542 = vadd.xlane.f32.xlu0 %v524_v1  ;;  %552 = vadd.xlane.f32.xlu1 %v529_v22  ;;  %v1175_v35 = vmul.f32 %v1093_v60, %v488_v63 }
 0x234   :  { %v485_v43 = vsub.f32 %v1084_v47, %v469_v40  ;;  %v525_v38 = vmul.f32 %v1175_v35, %v1175_v35 }
 0x235   :  { %v440_v18 = vpop.xlane.xlu1 %439 }
 0x236   :  { %v470_v50 = vmul.f32 0.03125, %v440_v18  ;;  %548 = vadd.xlane.f32.xlu1 %v527_v4  ;;  %v1178_v6 = vmul.f32 %v1093_v60, %v485_v43  ;;  %v1195_v43 = vld [vmem:[%s1271_s5] ss:$0 sm:$0xff] }
 0x238   :  { %v486_v31 = vsub.f32 %v1087_v52, %v470_v50  ;;  %v522_v47 = vmul.f32 %v1178_v6, %v1178_v6 }
 0x23a   :  { %544 = vadd.xlane.f32.xlu1 %v525_v38  ;;  %538 = vadd.xlane.f32.xlu0 %v522_v47  ;;  %v1186_v9 = vmul.f32 %v1093_v60, %v486_v31 }
 0x23c   :  { %v523_v11 = vmul.f32 %v1186_v9, %v1186_v9 }
 0x23e   :  { %540 = vadd.xlane.f32.xlu1 %v523_v11 }
 0x293   :  { %v559_v33 = vpop.xlane.xlu0 %558 }
 0x294   :  { %v580_v16 = vmul.f32 0.03125, %v559_v33 }
 0x296   :  { %v596_v21 = vadd.f32 1e-05, %v580_v16 }
 0x297   :  { %v555_v2 = vpop.xlane.xlu0 %554 }
 0x298   :  { %v578_v34 = vmul.f32 0.03125, %v555_v2 }
 0x29a   :  { %v594_v28 = vadd.f32 1e-05, %v578_v34 }
 0x29b   :  { %v551_v23 = vpop.xlane.xlu0 %550 }
 0x29c   :  { %v576_v30 = vmul.f32 0.03125, %v551_v23 }
 0x29e   :  { %v592_v53 = vadd.f32 1e-05, %v576_v30 }
 0x2a3   :  { %v567_v52 = vpop.xlane.xlu1 %566 }
 0x2a4   :  { %v584_v41 = vmul.f32 0.03125, %v567_v52 }
 0x2a6   :  { %v600_v13 = vadd.f32 1e-05, %v584_v41  ;;  %v1204_v41 = vld [vmem:[%s1272_s6] ss:$0 sm:$0xff] }
 0x2a7   :  { %v563_v15 = vpop.xlane.xlu1 %562 }
 0x2a8   :  { %v582_v32 = vmul.f32 0.03125, %v563_v15  ;;  %894 = vrsqrt.f32 %v600_v13 }
 0x2aa   :  { %v598_v17 = vadd.f32 1e-05, %v582_v32 }
 0x2ab   :  { %v569_v19 = vpop.xlane.xlu1 %568 }
 0x2ac   :  { %v585_v60 = vmul.f32 0.03125, %v569_v19  ;;  %896 = vrsqrt.f32 %v598_v17 }
 0x2ae   :  { %v601_v42 = vadd.f32 1e-05, %v585_v60 }
 0x2af   :  { %v565_v24 = vpop.xlane.xlu1 %564 }
 0x2b0   :  { %898 = vrsqrt.f32 %v601_v42  ;;  %v583_v12 = vmul.f32 0.03125, %v565_v24 }
 0x2b1   :  { %900 = vrsqrt.f32 %v596_v21 }
 0x2b2   :  { %v599_v29 = vadd.f32 1e-05, %v583_v12 }
 0x2b3   :  { %v547_v57 = vpop.xlane.xlu0 %546  ;;  %v561_v39 = vpop.xlane.xlu1 %560 }
 0x2b4   :  { %902 = vrsqrt.f32 %v599_v29  ;;  %v581_v45 = vmul.f32 0.03125, %v561_v39  ;;  %v574_v48 = vmul.f32 0.03125, %v547_v57 }
 0x2b5   :  { %904 = vrsqrt.f32 %v594_v28  ;;  %v895_v62 = vpop.eup %894 }
 0x2b6   :  { %v597_v49 = vadd.f32 1e-05, %v581_v45  ;;  %v590_v56 = vadd.f32 1e-05, %v574_v48  ;;  %v632_v59 = vmul.f32 %v895_v62, %v1114_v10 }
 0x2b7   :  { %v557_v54 = vpop.xlane.xlu1 %556 }
 0x2b8   :  { %v579_v55 = vmul.f32 0.03125, %v557_v54  ;;  %906 = vrsqrt.f32 %v597_v49  ;;  %v654_v50 = vmul.f32 %v1195_v43, %v632_v59 }
 0x2b9   :  { %908 = vrsqrt.f32 %v592_v53  ;;  %v897_v1 = vpop.eup %896 }
 0x2ba   :  { %v595_v26 = vadd.f32 1e-05, %v579_v55  ;;  %v630_v38 = vmul.f32 %v897_v1, %v1120_v14 }
 0x2bb   :  { %v543_v36 = vpop.xlane.xlu0 %542  ;;  %v553_v63 = vpop.xlane.xlu1 %552 }
 0x2bc   :  { %910 = vrsqrt.f32 %v595_v26  ;;  %v572_v22 = vmul.f32 0.03125, %v543_v36  ;;  %v577_v0 = vmul.f32 0.03125, %v553_v63  ;;  %v652_v17 = vmul.f32 %v1195_v43, %v630_v38 }
 0x2bd   :  { %v899_v40 = vpop.eup %898  ;;  %912 = vrsqrt.f32 %v590_v56 }
 0x2be   :  { %v593_v4 = vadd.f32 1e-05, %v577_v0  ;;  %v633_v18 = vmul.f32 %v899_v40, %v1126_v7  ;;  %v588_v10 = vadd.f32 1e-05, %v572_v22  ;;  %v901_v47 = vpop.eup %900  ;;  %v676_v7 = vadd.f32 %v1204_v41, %v654_v50 }
 0x2bf   :  { %v549_v31 = vpop.xlane.xlu1 %548  ;;  %v628_v19 = vmul.f32 %v901_v47, %v1096_v61  ;;  %v674_v29 = vadd.f32 %v1204_v41, %v652_v17 }
 0x2c0   :  { %v575_v11 = vmul.f32 0.03125, %v549_v31  ;;  %v655_v33 = vmul.f32 %v1195_v43, %v633_v18  ;;  %914 = vrsqrt.f32 %v593_v4 }
 0x2c1   :  { %v903_v52 = vpop.eup %902  ;;  %916 = vrsqrt.f32 %v588_v10  ;;  %v650_v57 = vmul.f32 %v1195_v43, %v628_v19 }
 0x2c2   :  { %v591_v13 = vadd.f32 1e-05, %v575_v11  ;;  %v677_v15 = vadd.f32 %v1204_v41, %v655_v33  ;;  %v631_v32 = vmul.f32 %v903_v52, %v1133_v25  ;;  %v905_v2 = vpop.eup %904 }
 0x2c3   :  { %v539_v14 = vpop.xlane.xlu0 %538  ;;  %v545_v16 = vpop.xlane.xlu1 %544  ;;  %v626_v25 = vmul.f32 %v905_v2, %v1103_v51  ;;  %v672_v56 = vadd.f32 %v1204_v41, %v650_v57 }
 0x2c4   :  { %918 = vrsqrt.f32 %v591_v13  ;;  %v570_v60 = vmul.f32 0.03125, %v539_v14  ;;  %v573_v34 = vmul.f32 0.03125, %v545_v16  ;;  %v693_v42 = vpack.c.bf16 %v677_v15, %v676_v7 }
 0x2c5   :  { %v653_v21 = vmul.f32 %v1195_v43, %v631_v32  ;;  %v907_v23 = vpop.eup %906  ;;  %v648_v54 = vmul.f32 %v1195_v43, %v626_v25 }
 0x2c6   :  { %v586_v24 = vadd.f32 1e-05, %v570_v60  ;;  %v589_v12 = vadd.f32 1e-05, %v573_v34  ;;  %838 = vmatpush3.bf16.msra.mxu0 %v693_v42  ;;  %v629_v61 = vmul.f32 %v907_v23, %v1140_v37  ;;  %v909_v39 = vpop.eup %908 }
 0x2c7   :  { %v541_v28 = vpop.xlane.xlu1 %540  ;;  %839 = vmatprep.subr.bf16.mxu0 %v926_v5  ;;  %v675_v30 = vadd.f32 %v1204_v41, %v653_v21  ;;  %v624_v26 = vmul.f32 %v909_v39, %v1108_v3  ;;  %v670_v1 = vadd.f32 %v1204_v41, %v648_v54 }
 0x2c8   :  { %920 = vrsqrt.f32 %v586_v24  ;;  %v571_v45 = vmul.f32 0.03125, %v541_v28  ;;  %v651_v62 = vmul.f32 %v1195_v43, %v629_v61 }
 0x2c9   :  { %v911_v48 = vpop.eup %910  ;;  %922 = vrsqrt.f32 %v589_v12  ;;  %v692_v49 = vpack.c.bf16 %v675_v30, %v674_v29  ;;  %v646_v40 = vmul.f32 %v1195_v43, %v624_v26 }
 0x2ca   :  { %v587_v51 = vadd.f32 1e-05, %v571_v45  ;;  %v627_v53 = vmul.f32 %v911_v48, %v1151_v20  ;;  %v913_v55 = vpop.eup %912  ;;  %v673_v37 = vadd.f32 %v1204_v41, %v651_v62 }
 0x2cb   :  { %840 = vmatpush3.bf16.msra.mxu0 %v692_v49  ;;  %v622_v22 = vmul.f32 %v913_v55, %v1143_v44  ;;  %v668_v38 = vadd.f32 %v1204_v41, %v646_v40 }
 0x2cc   :  { %924 = vrsqrt.f32 %v587_v51  ;;  %841 = vmatprep.subr.bf16.mxu0 %v926_v5  ;;  %v649_v59 = vmul.f32 %v1195_v43, %v627_v53  ;;  %v691_v36 = vpack.c.bf16 %v673_v37, %v672_v56 }
 0x2cd   :  { %v915_v63 = vpop.eup %914  ;;  %v644_v31 = vmul.f32 %v1195_v43, %v622_v22 }
 0x2ce   :  { %v671_v20 = vadd.f32 %v1204_v41, %v649_v59  ;;  %v625_v0 = vmul.f32 %v915_v63, %v1158_v58  ;;  %v917_v4 = vpop.eup %916 }
 0x2cf   :  { %842 = vmatpush3.bf16.msra.mxu0 %v691_v36  ;;  %v620_v58 = vmul.f32 %v917_v4, %v1161_v46  ;;  %v666_v13 = vadd.f32 %v1204_v41, %v644_v31 }
 0x2d0   :  { %843 = vmatprep.subr.bf16.mxu0 %v926_v5  ;;  %v690_v3 = vpack.c.bf16 %v671_v20, %v670_v1  ;;  %v647_v50 = vmul.f32 %v1195_v43, %v625_v0 }
 0x2d1   :  { %v919_v18 = vpop.eup %918  ;;  %v642_v32 = vmul.f32 %v1195_v43, %v620_v58 }
 0x2d2   :  { %v623_v10 = vmul.f32 %v919_v18, %v1169_v27  ;;  %v669_v44 = vadd.f32 %v1204_v41, %v647_v50 }
 0x2d3   :  { %844 = vmatpush3.bf16.msra.mxu0 %v690_v3  ;;  %v664_v19 = vadd.f32 %v1204_v41, %v642_v32 }
 0x2d4   :  { %845 = vmatprep.subr.bf16.mxu0 %v926_v5  ;;  %v645_v47 = vmul.f32 %v1195_v43, %v623_v10  ;;  %v689_v33 = vpack.c.bf16 %v669_v44, %v668_v38 }
 0x2d5   :  { %v921_v11 = vpop.eup %920 }
 0x2d6   :  { %v923_v52 = vpop.eup %922  ;;  %v667_v27 = vadd.f32 %v1204_v41, %v645_v47  ;;  %v618_v7 = vmul.f32 %v921_v11, %v1178_v6 }
 0x2d7   :  { %846 = vmatpush3.bf16.msra.mxu0 %v689_v33  ;;  %v621_v15 = vmul.f32 %v923_v52, %v1175_v35 }
 0x2d8   :  { %847 = vmatprep.subr.bf16.mxu0 %v926_v5  ;;  %v688_v46 = vpack.c.bf16 %v667_v27, %v666_v13  ;;  %v640_v17 = vmul.f32 %v1195_v43, %v618_v7 }
 0x2d9   :  { %v925_v2 = vpop.eup %924  ;;  %v643_v14 = vmul.f32 %v1195_v43, %v621_v15 }
 0x2da   :  { %v619_v16 = vmul.f32 %v925_v2, %v1186_v9  ;;  %v662_v34 = vadd.f32 %v1204_v41, %v640_v17  ;;  %v749_v9 = vld [vmem:[%s1273_s4] ss:$0 sm:$0xff] }
 0x2db   :  { %848 = vmatpush3.bf16.msra.mxu0 %v688_v46  ;;  %v665_v6 = vadd.f32 %v1204_v41, %v643_v14  ;;  %v772_v23 = vpack.c.bf16 %v749_v9, %v749_v9 }
 0x2dc   :  { %849 = vmatprep.subr.bf16.mxu0 %v926_v5  ;;  %v641_v35 = vmul.f32 %v1195_v43, %v619_v16 }
 0x2dd   :  { %v687_v60 = vpack.c.bf16 %v665_v6, %v664_v19 }
 0x2de   :  { %v663_v42 = vadd.f32 %v1204_v41, %v641_v35 }
 0x2df   :  { %850 = vmatpush3.bf16.msra.mxu0 %v687_v60 }
 0x2e0   :  { %851 = vmatprep.subr.bf16.mxu0 %v926_v5  ;;  %v686_v21 = vpack.c.bf16 %v663_v42, %v662_v34 }
 0x2e3   :  { %852 = vmatpush3.bf16.msra.mxu0 %v686_v21 }
 0x2e6   :  { %854 = vmatmul.mubr.msk.bf16.vlgmr.msra.gmra.mxu0 %vm978_vm2, %v772_v23 }
 0x3a6   :  { %v728_v24 = vpop.f32.mrf.mxu0 }
 0x3a7   :  { %737 = vst [vmem:[%s1274_s7] sm:$0xff] %v728_v24 }
 0x3a8   :  { %v855_v43 = vpop.f32.mrf.mxu0 }
 0x3aa   :  { %v731_v41 = vpop.f32.mrf.mxu0 }
 0x3ab   :  { %738 = vst [vmem:[%s1274_s7 + $0x8] sm:$0xff] %v731_v41 }
 0x3ac   :  { %v856_v12 = vpop.f32.mrf.mxu0 }

// kernel: erwin_embedding_forward.10
= control target key start
LH: loop header
LB: loop body
LE: loop exit
PB: predicated region body
PF: predicated region fallthrough
CT: control target
= control target key end

     0   :  { %v407_v0 = vmov 0.0   ;;  %vm408_vm0 = vmmov 0   ;;  %v262_v36 = vlaneseq  ;;  %s547_s3 = inlined_call_operand.vmem [shape: bf16[128,128], index: 3, kind: input, shape index: {}]   ;;  %s548_s2 = inlined_call_operand.vmem [shape: bf16[128,128], index: 2, kind: input, shape index: {}]   ;;  %s549_s1 = inlined_call_operand.vmem [shape: f32[16,128], index: 1, kind: input, shape index: {}]   ;;  %s550_s0 = inlined_call_operand.vmem [shape: f32[16,128], index: 0, kind: input, shape index: {}, may-alias: {0,7}]   ;;  %s551_s4 = inlined_call_operand.vmem [shape: f32[1,128], index: 4, kind: input, shape index: {}]   ;;  %s552_s5 = inlined_call_operand.vmem [shape: f32[1,128], index: 5, kind: input, shape index: {}]   ;;  %s553_s6 = inlined_call_operand.vmem [shape: f32[1,128], index: 6, kind: input, shape index: {}]   ;;  %s554_s7 = inlined_call_operand.vmem [shape: f32[16,128], index: 7, kind: output, shape index: {}, may-alias: {0,7}]  }
   0x1   :  { %345 = vmatprep.subr.bf16.mxu0 %v407_v0  ;;  %365 = vmatprep.subr.bf16.mxu1 %v407_v0  ;;  %v387_v1 = vld [vmem:[%s547_s3 + $0x38] sm:$0xff]   ;;  %v389_v3 = vld [vmem:[%s547_s3 + $0x30] sm:$0xff]   ;;  %v391_v5 = vld [vmem:[%s547_s3 + $0x28] sm:$0xff]  }
   0x2   :  { %v388_v2 = vld [vmem:[%s548_s2 + $0x38] sm:$0xff]   ;;  %361 = vmatprep.mubr.msk.bf16.mxu0 %vm408_vm0, %v407_v0  ;;  %381 = vmatprep.mubr.msk.bf16.mxu1 %vm408_vm0, %v407_v0  ;;  %v390_v4 = vld [vmem:[%s548_s2 + $0x30] sm:$0xff]   ;;  %v392_v6 = vld [vmem:[%s548_s2 + $0x28] sm:$0xff]   ;;  %v263_v37 = vand.u32 127, %v262_v36 }
   0x3   :  { %346 = vmatpush3.bf16.msra.mxu0 %v387_v1  ;;  %366 = vmatpush3.bf16.msra.mxu1 %v388_v2  ;;  %v393_v7 = vld [vmem:[%s547_s3 + $0x20] sm:$0xff]   ;;  %v395_v9 = vld [vmem:[%s547_s3 + $0x18] sm:$0xff]   ;;  %v397_v11 = vld [vmem:[%s547_s3 + $0x10] sm:$0xff]  }
   0x4   :  { %347 = vmatprep.subr.bf16.mxu0 %v407_v0  ;;  %367 = vmatprep.subr.bf16.mxu1 %v407_v0  ;;  %v394_v8 = vld [vmem:[%s548_s2 + $0x20] sm:$0xff]   ;;  %v396_v10 = vld [vmem:[%s548_s2 + $0x18] sm:$0xff]   ;;  %v398_v12 = vld [vmem:[%s548_s2 + $0x10] sm:$0xff]   ;;  %vm264_vm1 = vcmp.lt.s32.totalorder %v263_v37, 32 }
   0x5   :  { %v399_v13 = vld [vmem:[%s547_s3 + $0x8] sm:$0xff]   ;;  %v401_v15 = vld [vmem:[%s547_s3] sm:$0xff]   ;;  %v324_v40 = vsel %vm264_vm1, 1.0, %v407_v0 }
   0x6   :  { %v400_v14 = vld [vmem:[%s548_s2 + $0x8] sm:$0xff]   ;;  %v46_v16 = vld [vmem:[%s549_s1] sm:$0xff] }
   0x7   :  { %348 = vmatpush3.bf16.msra.mxu0 %v389_v3  ;;  %368 = vmatpush3.bf16.msra.mxu1 %v390_v4  ;;  %v47_v17 = vld [vmem:[%s549_s1 + $0x8] sm:$0xff]  ;;  %v402_v18 = vld [vmem:[%s548_s2] sm:$0xff]  }
   0x8   :  { %349 = vmatprep.subr.bf16.mxu0 %v407_v0  ;;  %369 = vmatprep.subr.bf16.mxu1 %v407_v0  ;;  %v27_v19 = vld [vmem:[%s550_s0] sm:$0xff]  ;;  %v526_v20 = vld [vmem:[%s550_s0 + $0x8] sm:$0xff]  ;;  %v48_v21 = vpack.c.bf16 %v47_v17, %v46_v16 }
   0x9   :  { %v29_v22 = vpack.c.bf16 %v526_v20, %v27_v19  ;;  %v323_v25 = vld [vmem:[%s551_s4] ss:$0 sm:$0xff] }
   0xa   :  { %v325_v56 = vld [vmem:[%s552_s5] ss:$0 sm:$0xff] }
   0xb   :  { %350 = vmatpush3.bf16.msra.mxu0 %v391_v5  ;;  %370 = vmatpush3.bf16.msra.mxu1 %v392_v6  ;;  %v326_v58 = vld [vmem:[%s553_s6] ss:$0 sm:$0xff] }
   0xc   :  { %351 = vmatprep.subr.bf16.mxu0 %v407_v0  ;;  %371 = vmatprep.subr.bf16.mxu1 %v407_v0 }
   0xf   :  { %352 = vmatpush3.bf16.msra.mxu0 %v393_v7  ;;  %372 = vmatpush3.bf16.msra.mxu1 %v394_v8 }
  0x10   :  { %353 = vmatprep.subr.bf16.mxu0 %v407_v0  ;;  %373 = vmatprep.subr.bf16.mxu1 %v407_v0 }
  0x13   :  { %354 = vmatpush3.bf16.msra.mxu0 %v395_v9  ;;  %374 = vmatpush3.bf16.msra.mxu1 %v396_v10 }
  0x14   :  { %355 = vmatprep.subr.bf16.mxu0 %v407_v0  ;;  %375 = vmatprep.subr.bf16.mxu1 %v407_v0 }
  0x17   :  { %356 = vmatpush3.bf16.msra.mxu0 %v397_v11  ;;  %376 = vmatpush3.bf16.msra.mxu1 %v398_v12 }
  0x18   :  { %357 = vmatprep.subr.bf16.mxu0 %v407_v0  ;;  %377 = vmatprep.subr.bf16.mxu1 %v407_v0 }
  0x1b   :  { %358 = vmatpush3.bf16.msra.mxu0 %v399_v13  ;;  %378 = vmatpush3.bf16.msra.mxu1 %v400_v14 }
  0x1c   :  { %359 = vmatprep.subr.bf16.mxu0 %v407_v0  ;;  %379 = vmatprep.subr.bf16.mxu1 %v407_v0 }
  0x1f   :  { %360 = vmatpush3.bf16.msra.mxu0 %v401_v15  ;;  %380 = vmatpush3.bf16.msra.mxu1 %v402_v18 }
  0x22   :  { %362 = vmatmul.mubr.bf16.vlgmr.msra.gmra.mxu0 %v48_v21  ;;  %382 = vmatmul.mubr.bf16.vlgmr.msra.gmra.mxu1 %v29_v22 }
  0xe2   :  { %v147_v23 = vpop.f32.mrf.mxu0  ;;  %v236_v24 = vpop.f32.mrf.mxu1 }
  0xe3   :  { %v237_v26 = vadd.f32 %v236_v24, %v147_v23 }
  0xe4   :  { %v363_v27 = vpop.f32.mrf.mxu0  ;;  %v383_v28 = vpop.f32.mrf.mxu1 }
  0xe5   :  { %v250_v30 = vadd.f32 %v323_v25, %v237_v26 }
  0xe6   :  { %v150_v29 = vpop.f32.mrf.mxu0  ;;  %v239_v31 = vpop.f32.mrf.mxu1 }
  0xe7   :  { %v240_v32 = vadd.f32 %v239_v31, %v150_v29  ;;  %254 = vadd.xlane.f32.xlu0 %v250_v30 }
  0xe8   :  { %v364_v33 = vpop.f32.mrf.mxu0  ;;  %v384_v34 = vpop.f32.mrf.mxu1 }
  0xe9   :  { %v251_v35 = vadd.f32 %v323_v25, %v240_v32 }
  0xeb   :  { %256 = vadd.xlane.f32.xlu0 %v251_v35 }
 0x170   :  { %v255_v38 = vpop.xlane.xlu0 %254 }
 0x171   :  { %v258_v39 = vmul.f32 0.03125, %v255_v38 }
 0x173   :  { %v260_v41 = vsub.f32 %v250_v30, %v258_v39 }
 0x174   :  { %v257_v42 = vpop.xlane.xlu0 %256 }
 0x175   :  { %v259_v43 = vmul.f32 0.03125, %v257_v42  ;;  %v267_v44 = vmul.f32 %v324_v40, %v260_v41 }
 0x177   :  { %v261_v45 = vsub.f32 %v251_v35, %v259_v43  ;;  %v269_v46 = vmul.f32 %v267_v44, %v267_v44 }
 0x179   :  { %271 = vadd.xlane.f32.xlu1 %v269_v46  ;;  %v268_v47 = vmul.f32 %v324_v40, %v261_v45 }
 0x17b   :  { %v270_v48 = vmul.f32 %v268_v47, %v268_v47 }
 0x17d   :  { %273 = vadd.xlane.f32.xlu1 %v270_v48 }
 0x202   :  { %v272_v49 = vpop.xlane.xlu1 %271 }
 0x203   :  { %v275_v50 = vmul.f32 0.03125, %v272_v49 }
 0x205   :  { %v277_v51 = vadd.f32 1e-05, %v275_v50 }
 0x206   :  { %v274_v52 = vpop.xlane.xlu1 %273 }
 0x207   :  { %403 = vrsqrt.f32 %v277_v51  ;;  %v276_v53 = vmul.f32 0.03125, %v274_v52 }
 0x209   :  { %v278_v54 = vadd.f32 1e-05, %v276_v53 }
 0x20b   :  { %405 = vrsqrt.f32 %v278_v54 }
 0x214   :  { %v404_v55 = vpop.eup %403 }
 0x215   :  { %v281_v57 = vmul.f32 %v404_v55, %v267_v44 }
 0x217   :  { %v289_v59 = vmul.f32 %v325_v56, %v281_v57 }
 0x218   :  { %v406_v60 = vpop.eup %405 }
 0x219   :  { %v297_v61 = vadd.f32 %v326_v58, %v289_v59  ;;  %v282_v62 = vmul.f32 %v406_v60, %v268_v47 }
 0x21b   :  { %v299_v63 = vadd.f32 %v297_v61, %v27_v19  ;;  %v290_v0 = vmul.f32 %v325_v56, %v282_v62 }
 0x21d   :  { %301 = vst [vmem:[%s554_s7] sm:$0xff] %v299_v63  ;;  %v298_v1 = vadd.f32 %v326_v58, %v290_v0 }
 0x21f   :  { %v300_v2 = vadd.f32 %v298_v1, %v526_v20 }
 0x221   :  { %302 = vst [vmem:[%s554_s7 + $0x8] sm:$0xff] %v300_v2 }

</bundles_post_ra>
